<compile_context>
chip_gen: v5e
topology: v5e:2x2
jax: 0.10.0
libtpu: 0.0.40
codegen_flags: <defaults>
</compile_context>

<pallas_src>
import functools

import jax
import jax.numpy as jnp
from jax.experimental import pallas as pl
from jax.experimental.pallas import tpu as pltpu

BN_EPS = 1e-5


def _fold_bn(gamma, beta, mean, var, eps=BN_EPS):
    scale = gamma / jnp.sqrt(var + eps)
    bias = beta - mean * scale
    return scale, bias


def _pick_row_tile(hout, target=64):
    """Largest divisor of hout that is <= target, preferring multiples of 8."""
    divs = [t for t in range(1, min(hout, target) + 1) if hout % t == 0]
    mult8 = [t for t in divs if t % 8 == 0]
    if mult8:
        return max(mult8)
    return max(divs) if divs else hout


# ----------------------- fused separable-conv kernel -------------------------
def _sep_conv_kernel(x_ref, wdw_ref, s1_ref, b1_ref, wpw_ref, s2_ref, b2_ref,
                     o_ref, *, stride, k, th, wout, cin, cout, matmul_dtype):
    # x_ref: (1, Hp, Wp, Cin) spatially padded input for this batch element.
    #        Its block index is constant along the strip axis -> stays resident.
    # o_ref: (1, TH, Wout, Cout) output row strip.
    r = pl.program_id(1)
    win_h = (th - 1) * stride + k
    win_w = (wout - 1) * stride + k
    h0 = pl.multiple_of(r * (th * stride), th * stride)

    xs = x_ref[0, pl.ds(h0, win_h), pl.ds(0, win_w), :]      # (win_h, win_w, Cin)
    wdw = wdw_ref[...]                                       # (k*k, Cin)

    if stride > 1:
        # Pad so each tap window reshapes cleanly to (th, stride, wout, stride)
        # -- avoids strided sublane slices (XLU gathers), keeps this VPU-bound.
        xs = jnp.pad(xs, ((0, stride - 1), (0, stride - 1), (0, 0)))

    # depthwise KxK conv (VPU broadcast-multiply-accumulate over taps)
    acc = jnp.zeros((th, wout, cin), jnp.float32)
    for dy in range(k):
        for dx in range(k):
            if stride == 1:
                tap = jax.lax.slice(xs, (dy, dx, 0), (dy + th, dx + wout, cin))
            else:
                sub = jax.lax.slice(
                    xs, (dy, dx, 0),
                    (dy + th * stride, dx + wout * stride, cin))
                tap = sub.reshape(th, stride, wout, stride, cin)[:, 0, :, 0, :]
            w_tap = wdw[dy * k + dx:dy * k + dx + 1, :].reshape(1, 1, cin)
            acc = acc + tap * w_tap

    # BatchNorm1 (eval-mode affine) + SiLU
    y = acc * s1_ref[...] + b1_ref[...]
    y = y * jax.nn.sigmoid(y)

    # pointwise 1x1 conv on the MXU (bf16 inputs, f32 accumulate) + BN2 + SiLU
    ym = y.reshape(th * wout, cin).astype(matmul_dtype)
    z = jnp.dot(ym, wpw_ref[...], preferred_element_type=jnp.float32)
    z = z * s2_ref[...] + b2_ref[...]
    z = z * jax.nn.sigmoid(z)
    o_ref[0] = z.reshape(th, wout, cout)


# ------------------------------- public wrapper -------------------------------
def separable_activation_conv2d(x_nchw, params, *, kernel_size=3, stride=1,
                                padding=1, row_tile=None,
                                matmul_dtype=jnp.bfloat16):
    n, cin, h, w = x_nchw.shape
    k = kernel_size
    cout = params["w_pw"].shape[1]
    hout = (h + 2 * padding - k) // stride + 1
    wout = (w + 2 * padding - k) // stride + 1

    # NCHW -> NHWC (channels on lanes).  Only the small Cin input is padded in
    # the wrapper; the large depthwise intermediate never leaves the kernel.
    x = jnp.transpose(x_nchw, (0, 2, 3, 1)).astype(jnp.float32)
    xp = jnp.pad(x, ((0, 0), (padding, padding), (padding, padding), (0, 0)))
    hp, wp = h + 2 * padding, w + 2 * padding

    s1, b1 = _fold_bn(*params["bn1"])
    s2, b2 = _fold_bn(*params["bn2"])

    w_dw = params["w_dw"].reshape(k * k, cin).astype(jnp.float32)
    w_pw = params["w_pw"].astype(matmul_dtype)

    th = row_tile if (row_tile is not None and hout % row_tile == 0) \
        else _pick_row_tile(hout)
    n_strips = hout // th

    kern = functools.partial(_sep_conv_kernel, stride=stride, k=k, th=th,
                             wout=wout, cin=cin, cout=cout,
                             matmul_dtype=matmul_dtype)
    out = pl.pallas_call(
        kern,
        out_shape=jax.ShapeDtypeStruct((n, hout, wout, cout), jnp.float32),
        grid=(n, n_strips),
        in_specs=[
            pl.BlockSpec((1, hp, wp, cin), lambda b, r: (b, 0, 0, 0)),
            pl.BlockSpec((k * k, cin), lambda b, r: (0, 0)),
            pl.BlockSpec((1, cin), lambda b, r: (0, 0)),
            pl.BlockSpec((1, cin), lambda b, r: (0, 0)),
            pl.BlockSpec((cin, cout), lambda b, r: (0, 0)),
            pl.BlockSpec((1, cout), lambda b, r: (0, 0)),
            pl.BlockSpec((1, cout), lambda b, r: (0, 0)),
        ],
        out_specs=pl.BlockSpec((1, th, wout, cout), lambda b, r: (b, r, 0, 0)),
        compiler_params=pltpu.CompilerParams(
            dimension_semantics=("parallel", "parallel")),
    )(xp, w_dw, s1.reshape(1, -1), b1.reshape(1, -1), w_pw,
      s2.reshape(1, -1), b2.reshape(1, -1))

    return jnp.transpose(out, (0, 3, 1, 2))                  # back to NCHW


# ------------------------------ params & reference ----------------------------
def init_params(key, cin, cout, k):
    ks = jax.random.split(key, 10)

    def nrm(kk, shape, s=0.1):
        return jax.random.normal(kk, shape, jnp.float32) * s

    p = {}
    p["w_dw"] = nrm(ks[0], (k, k, cin), 0.3)                  # depthwise, no bias
    p["w_pw"] = nrm(ks[1], (cin, cout), 0.3)                  # pointwise 1x1, no bias
    p["bn1"] = (1.0 + nrm(ks[2], (cin,), 0.05), nrm(ks[3], (cin,), 0.05),
                nrm(ks[4], (cin,), 0.05), 1.0 + jnp.abs(nrm(ks[5], (cin,), 0.05)))
    p["bn2"] = (1.0 + nrm(ks[6], (cout,), 0.05), nrm(ks[7], (cout,), 0.05),
                nrm(ks[8], (cout,), 0.05), 1.0 + jnp.abs(nrm(ks[9], (cout,), 0.05)))
    return p


def _reference(x_nchw, params, *, kernel_size, stride, padding):
    """Pure-JAX (XLA) reference of the PyTorch forward, eval-mode BN."""
    k = kernel_size
    x = jnp.transpose(x_nchw, (0, 2, 3, 1)).astype(jnp.float32)
    cin = x.shape[-1]
    y = jax.lax.conv_general_dilated(
        x, params["w_dw"].reshape(k, k, 1, cin), (stride, stride),
        [(padding, padding), (padding, padding)],
        dimension_numbers=("NHWC", "HWIO", "NHWC"),
        feature_group_count=cin)
    s1, b1 = _fold_bn(*params["bn1"])
    y = y * s1 + b1
    y = y * jax.nn.sigmoid(y)
    z = jnp.einsum("nhwc,cd->nhwd", y, params["w_pw"])
    s2, b2 = _fold_bn(*params["bn2"])
    z = z * s2 + b2
    z = z * jax.nn.sigmoid(z)
    return jnp.transpose(z, (0, 3, 1, 2))


if __name__ == "__main__":
    key = jax.random.PRNGKey(0)
    kx, kp = jax.random.split(key)
    N, Cin, H, W = 2, 4, 16, 16
    Cout, K, stride, padding = 8, 3, 1, 1

    x = jax.random.normal(kx, (N, Cin, H, W), jnp.float32)
    params = init_params(kp, Cin, Cout, K)

    out = separable_activation_conv2d(
        x, params, kernel_size=K, stride=stride, padding=padding, row_tile=8)
    jax.block_until_ready(out)
    assert out.shape == (N, Cout, H, W)

    ref = _reference(x, params, kernel_size=K, stride=stride, padding=padding)
    max_err = float(jnp.max(jnp.abs(out - ref)))
    assert max_err < 3e-2, f"max abs error vs reference: {max_err}"
    print("KERNEL_OK")
</pallas_src>

<mosaic_0001>
module attributes {stable_mosaic.version = 11 : i64} {
  func.func @_sep_conv_kernel(%arg0: i32, %arg1: i32, %arg2: memref<1x18x18x4xf32, #tpu.memory_space<vmem>>, %arg3: memref<9x4xf32, #tpu.memory_space<vmem>>, %arg4: memref<1x4xf32, #tpu.memory_space<vmem>>, %arg5: memref<1x4xf32, #tpu.memory_space<vmem>>, %arg6: memref<4x8xbf16, #tpu.memory_space<vmem>>, %arg7: memref<1x8xf32, #tpu.memory_space<vmem>>, %arg8: memref<1x8xf32, #tpu.memory_space<vmem>>, %arg9: memref<1x8x16x8xf32, #tpu.memory_space<vmem>>) attributes {dimension_semantics = [#tpu.dimension_semantics<parallel>, #tpu.dimension_semantics<parallel>], iteration_bounds = array<i64: 2, 2>, scalar_prefetch = 0 : i64, scratch_operands = 0 : i64, tpu.core_type = #tpu.core_type<tc>, window_params = [{transform_indices = @transform_0, window_bounds = array<i64: 1, 18, 18, 4>}, {pipeline_mode = #tpu.pipeline_mode<synchronous>, transform_indices = @transform_1, window_bounds = array<i64: 9, 4>}, {pipeline_mode = #tpu.pipeline_mode<synchronous>, transform_indices = @transform_2, window_bounds = array<i64: 1, 4>}, {pipeline_mode = #tpu.pipeline_mode<synchronous>, transform_indices = @transform_3, window_bounds = array<i64: 1, 4>}, {pipeline_mode = #tpu.pipeline_mode<synchronous>, transform_indices = @transform_4, window_bounds = array<i64: 4, 8>}, {pipeline_mode = #tpu.pipeline_mode<synchronous>, transform_indices = @transform_5, window_bounds = array<i64: 1, 8>}, {pipeline_mode = #tpu.pipeline_mode<synchronous>, transform_indices = @transform_6, window_bounds = array<i64: 1, 8>}, {transform_indices = @transform_7, window_bounds = array<i64: 1, 8, 16, 8>}]} {
    %c8_i32 = arith.constant 8 : i32
    %0 = arith.muli %arg1, %c8_i32 : i32
    %1 = tpu.assume_multiple %0, 8 : i32
    %c0 = arith.constant 0 : index
    %2 = arith.index_cast %1 : i32 to index
    %c0_0 = arith.constant 0 : index
    %c0_1 = arith.constant 0 : index
    %3 = vector.load %arg2[%c0, %2, %c0_0, %c0_1] : memref<1x18x18x4xf32, #tpu.memory_space<vmem>>, vector<1x10x18x4xf32>
    %4 = vector.shape_cast %3 : vector<1x10x18x4xf32> to vector<10x18x4xf32>
    %c0_2 = arith.constant 0 : index
    %c0_3 = arith.constant 0 : index
    %5 = vector.load %arg3[%c0_2, %c0_3] : memref<9x4xf32, #tpu.memory_space<vmem>>, vector<9x4xf32>
    %cst = arith.constant 0.000000e+00 : f32
    %6 = vector.broadcast %cst : f32 to vector<8x16x4xf32>
    %7 = vector.extract_strided_slice %4 {offsets = [0, 0, 0], sizes = [8, 16, 4], strides = [1, 1, 1]} : vector<10x18x4xf32> to vector<8x16x4xf32>
    %8 = vector.extract_strided_slice %5 {offsets = [0, 0], sizes = [1, 4], strides = [1, 1]} : vector<9x4xf32> to vector<1x4xf32>
    %9 = vector.shape_cast %8 : vector<1x4xf32> to vector<1x1x4xf32>
    %10 = vector.broadcast %9 : vector<1x1x4xf32> to vector<8x16x4xf32>
    %11 = arith.mulf %7, %10 : vector<8x16x4xf32>
    %12 = arith.addf %6, %11 : vector<8x16x4xf32>
    %13 = vector.extract_strided_slice %4 {offsets = [0, 1, 0], sizes = [8, 16, 4], strides = [1, 1, 1]} : vector<10x18x4xf32> to vector<8x16x4xf32>
    %14 = vector.extract_strided_slice %5 {offsets = [1, 0], sizes = [1, 4], strides = [1, 1]} : vector<9x4xf32> to vector<1x4xf32>
    %15 = vector.shape_cast %14 : vector<1x4xf32> to vector<1x1x4xf32>
    %16 = vector.broadcast %15 : vector<1x1x4xf32> to vector<8x16x4xf32>
    %17 = arith.mulf %13, %16 : vector<8x16x4xf32>
    %18 = arith.addf %12, %17 : vector<8x16x4xf32>
    %19 = vector.extract_strided_slice %4 {offsets = [0, 2, 0], sizes = [8, 16, 4], strides = [1, 1, 1]} : vector<10x18x4xf32> to vector<8x16x4xf32>
    %20 = vector.extract_strided_slice %5 {offsets = [2, 0], sizes = [1, 4], strides = [1, 1]} : vector<9x4xf32> to vector<1x4xf32>
    %21 = vector.shape_cast %20 : vector<1x4xf32> to vector<1x1x4xf32>
    %22 = vector.broadcast %21 : vector<1x1x4xf32> to vector<8x16x4xf32>
    %23 = arith.mulf %19, %22 : vector<8x16x4xf32>
    %24 = arith.addf %18, %23 : vector<8x16x4xf32>
    %25 = vector.extract_strided_slice %4 {offsets = [1, 0, 0], sizes = [8, 16, 4], strides = [1, 1, 1]} : vector<10x18x4xf32> to vector<8x16x4xf32>
    %26 = vector.extract_strided_slice %5 {offsets = [3, 0], sizes = [1, 4], strides = [1, 1]} : vector<9x4xf32> to vector<1x4xf32>
    %27 = vector.shape_cast %26 : vector<1x4xf32> to vector<1x1x4xf32>
    %28 = vector.broadcast %27 : vector<1x1x4xf32> to vector<8x16x4xf32>
    %29 = arith.mulf %25, %28 : vector<8x16x4xf32>
    %30 = arith.addf %24, %29 : vector<8x16x4xf32>
    %31 = vector.extract_strided_slice %4 {offsets = [1, 1, 0], sizes = [8, 16, 4], strides = [1, 1, 1]} : vector<10x18x4xf32> to vector<8x16x4xf32>
    %32 = vector.extract_strided_slice %5 {offsets = [4, 0], sizes = [1, 4], strides = [1, 1]} : vector<9x4xf32> to vector<1x4xf32>
    %33 = vector.shape_cast %32 : vector<1x4xf32> to vector<1x1x4xf32>
    %34 = vector.broadcast %33 : vector<1x1x4xf32> to vector<8x16x4xf32>
    %35 = arith.mulf %31, %34 : vector<8x16x4xf32>
    %36 = arith.addf %30, %35 : vector<8x16x4xf32>
    %37 = vector.extract_strided_slice %4 {offsets = [1, 2, 0], sizes = [8, 16, 4], strides = [1, 1, 1]} : vector<10x18x4xf32> to vector<8x16x4xf32>
    %38 = vector.extract_strided_slice %5 {offsets = [5, 0], sizes = [1, 4], strides = [1, 1]} : vector<9x4xf32> to vector<1x4xf32>
    %39 = vector.shape_cast %38 : vector<1x4xf32> to vector<1x1x4xf32>
    %40 = vector.broadcast %39 : vector<1x1x4xf32> to vector<8x16x4xf32>
    %41 = arith.mulf %37, %40 : vector<8x16x4xf32>
    %42 = arith.addf %36, %41 : vector<8x16x4xf32>
    %43 = vector.extract_strided_slice %4 {offsets = [2, 0, 0], sizes = [8, 16, 4], strides = [1, 1, 1]} : vector<10x18x4xf32> to vector<8x16x4xf32>
    %44 = vector.extract_strided_slice %5 {offsets = [6, 0], sizes = [1, 4], strides = [1, 1]} : vector<9x4xf32> to vector<1x4xf32>
    %45 = vector.shape_cast %44 : vector<1x4xf32> to vector<1x1x4xf32>
    %46 = vector.broadcast %45 : vector<1x1x4xf32> to vector<8x16x4xf32>
    %47 = arith.mulf %43, %46 : vector<8x16x4xf32>
    %48 = arith.addf %42, %47 : vector<8x16x4xf32>
    %49 = vector.extract_strided_slice %4 {offsets = [2, 1, 0], sizes = [8, 16, 4], strides = [1, 1, 1]} : vector<10x18x4xf32> to vector<8x16x4xf32>
    %50 = vector.extract_strided_slice %5 {offsets = [7, 0], sizes = [1, 4], strides = [1, 1]} : vector<9x4xf32> to vector<1x4xf32>
    %51 = vector.shape_cast %50 : vector<1x4xf32> to vector<1x1x4xf32>
    %52 = vector.broadcast %51 : vector<1x1x4xf32> to vector<8x16x4xf32>
    %53 = arith.mulf %49, %52 : vector<8x16x4xf32>
    %54 = arith.addf %48, %53 : vector<8x16x4xf32>
    %55 = vector.extract_strided_slice %4 {offsets = [2, 2, 0], sizes = [8, 16, 4], strides = [1, 1, 1]} : vector<10x18x4xf32> to vector<8x16x4xf32>
    %56 = vector.extract_strided_slice %5 {offsets = [8, 0], sizes = [1, 4], strides = [1, 1]} : vector<9x4xf32> to vector<1x4xf32>
    %57 = vector.shape_cast %56 : vector<1x4xf32> to vector<1x1x4xf32>
    %58 = vector.broadcast %57 : vector<1x1x4xf32> to vector<8x16x4xf32>
    %59 = arith.mulf %55, %58 : vector<8x16x4xf32>
    %60 = arith.addf %54, %59 : vector<8x16x4xf32>
    %c0_4 = arith.constant 0 : index
    %c0_5 = arith.constant 0 : index
    %61 = vector.load %arg4[%c0_4, %c0_5] : memref<1x4xf32, #tpu.memory_space<vmem>>, vector<1x4xf32>
    %62 = vector.shape_cast %61 : vector<1x4xf32> to vector<1x1x4xf32>
    %63 = vector.broadcast %62 : vector<1x1x4xf32> to vector<8x16x4xf32>
    %64 = arith.mulf %60, %63 : vector<8x16x4xf32>
    %c0_6 = arith.constant 0 : index
    %c0_7 = arith.constant 0 : index
    %65 = vector.load %arg5[%c0_6, %c0_7] : memref<1x4xf32, #tpu.memory_space<vmem>>, vector<1x4xf32>
    %66 = vector.shape_cast %65 : vector<1x4xf32> to vector<1x1x4xf32>
    %67 = vector.broadcast %66 : vector<1x1x4xf32> to vector<8x16x4xf32>
    %68 = arith.addf %64, %67 : vector<8x16x4xf32>
    %69 = arith.negf %68 : vector<8x16x4xf32>
    %70 = math.exp %69 : vector<8x16x4xf32>
    %cst_8 = arith.constant 1.000000e+00 : f32
    %71 = vector.broadcast %cst_8 : f32 to vector<8x16x4xf32>
    %72 = arith.addf %71, %70 : vector<8x16x4xf32>
    %73 = arith.divf %71, %72 : vector<8x16x4xf32>
    %74 = arith.mulf %68, %73 : vector<8x16x4xf32>
    %75 = vector.shape_cast %74 : vector<8x16x4xf32> to vector<128x4xf32>
    %76 = arith.truncf %75 : vector<128x4xf32> to vector<128x4xbf16>
    %c0_9 = arith.constant 0 : index
    %c0_10 = arith.constant 0 : index
    %77 = vector.load %arg6[%c0_9, %c0_10] : memref<4x8xbf16, #tpu.memory_space<vmem>>, vector<4x8xbf16>
    %cst_11 = arith.constant dense<0.000000e+00> : vector<128x8xf32>
    %78 = tpu.matmul %76, %77, %cst_11 {dimension_numbers = #tpu.dot_dimension_numbers<[1], [0], [0], [1], [0, 0, 1, 1], [], []>} : vector<128x4xbf16>, vector<4x8xbf16>, vector<128x8xf32> -> vector<128x8xf32>
    %c0_12 = arith.constant 0 : index
    %c0_13 = arith.constant 0 : index
    %79 = vector.load %arg7[%c0_12, %c0_13] : memref<1x8xf32, #tpu.memory_space<vmem>>, vector<1x8xf32>
    %80 = vector.broadcast %79 : vector<1x8xf32> to vector<128x8xf32>
    %81 = arith.mulf %78, %80 : vector<128x8xf32>
    %c0_14 = arith.constant 0 : index
    %c0_15 = arith.constant 0 : index
    %82 = vector.load %arg8[%c0_14, %c0_15] : memref<1x8xf32, #tpu.memory_space<vmem>>, vector<1x8xf32>
    %83 = vector.broadcast %82 : vector<1x8xf32> to vector<128x8xf32>
    %84 = arith.addf %81, %83 : vector<128x8xf32>
    %85 = arith.negf %84 : vector<128x8xf32>
    %86 = math.exp %85 : vector<128x8xf32>
    %cst_16 = arith.constant 1.000000e+00 : f32
    %87 = vector.broadcast %cst_16 : f32 to vector<128x8xf32>
    %88 = arith.addf %87, %86 : vector<128x8xf32>
    %89 = arith.divf %87, %88 : vector<128x8xf32>
    %90 = arith.mulf %84, %89 : vector<128x8xf32>
    %91 = vector.shape_cast %90 : vector<128x8xf32> to vector<8x16x8xf32>
    %c0_17 = arith.constant 0 : index
    %c0_18 = arith.constant 0 : index
    %c0_19 = arith.constant 0 : index
    %c0_20 = arith.constant 0 : index
    %92 = vector.load %arg9[%c0_17, %c0_18, %c0_19, %c0_20] : memref<1x8x16x8xf32, #tpu.memory_space<vmem>>, vector<1x8x16x8xf32>
    %93 = vector.shape_cast %92 : vector<1x8x16x8xf32> to vector<8x16x8xf32>
    %94 = vector.shape_cast %91 : vector<8x16x8xf32> to vector<1x8x16x8xf32>
    tpu.vector_store %arg9[%c0_17, %c0_18, %c0_19, %c0_20], %94 {strides = array<i32>} : memref<1x8x16x8xf32, #tpu.memory_space<vmem>>, vector<1x8x16x8xf32>,
    return
  }
  func.func @transform_0(%arg0: i32, %arg1: i32) -> (i32, i32, i32, i32) {
    %c0_i32 = arith.constant 0 : i32
    %c0_i32_0 = arith.constant 0 : i32
    %c0_i32_1 = arith.constant 0 : i32
    %c0_i32_2 = arith.constant 0 : i32
    return %arg0, %c0_i32, %c0_i32_0, %c0_i32_1 : i32, i32, i32, i32
  }
  func.func @transform_1(%arg0: i32, %arg1: i32) -> (i32, i32) {
    %c0_i32 = arith.constant 0 : i32
    %c0_i32_0 = arith.constant 0 : i32
    %c0_i32_1 = arith.constant 0 : i32
    return %c0_i32, %c0_i32_0 : i32, i32
  }
  func.func @transform_2(%arg0: i32, %arg1: i32) -> (i32, i32) {
    %c0_i32 = arith.constant 0 : i32
    %c0_i32_0 = arith.constant 0 : i32
    %c0_i32_1 = arith.constant 0 : i32
    return %c0_i32, %c0_i32_0 : i32, i32
  }
  func.func @transform_3(%arg0: i32, %arg1: i32) -> (i32, i32) {
    %c0_i32 = arith.constant 0 : i32
    %c0_i32_0 = arith.constant 0 : i32
    %c0_i32_1 = arith.constant 0 : i32
    return %c0_i32, %c0_i32_0 : i32, i32
  }
  func.func @transform_4(%arg0: i32, %arg1: i32) -> (i32, i32) {
    %c0_i32 = arith.constant 0 : i32
    %c0_i32_0 = arith.constant 0 : i32
    %c0_i32_1 = arith.constant 0 : i32
    return %c0_i32, %c0_i32_0 : i32, i32
  }
  func.func @transform_5(%arg0: i32, %arg1: i32) -> (i32, i32) {
    %c0_i32 = arith.constant 0 : i32
    %c0_i32_0 = arith.constant 0 : i32
    %c0_i32_1 = arith.constant 0 : i32
    return %c0_i32, %c0_i32_0 : i32, i32
  }
  func.func @transform_6(%arg0: i32, %arg1: i32) -> (i32, i32) {
    %c0_i32 = arith.constant 0 : i32
    %c0_i32_0 = arith.constant 0 : i32
    %c0_i32_1 = arith.constant 0 : i32
    return %c0_i32, %c0_i32_0 : i32, i32
  }
  func.func @transform_7(%arg0: i32, %arg1: i32) -> (i32, i32, i32, i32) {
    %c0_i32 = arith.constant 0 : i32
    %c0_i32_0 = arith.constant 0 : i32
    %c0_i32_1 = arith.constant 0 : i32
    return %arg0, %arg1, %c0_i32, %c0_i32_0 : i32, i32, i32, i32
  }
}

</mosaic_0001>

<bundles_post_ra>
// kernel: tpu_custom_call.1
= control target key start
LH: loop header
LB: loop body
LE: loop exit
PB: predicated region body
PF: predicated region fallthrough
CT: control target
= control target key end

     0   :  { %s2397_s24 = smov 0   ;;  %s2399_s25 = smov 0   ;;  %s3518_s0 = inlined_call_operand.vmem [shape: f32[2,18,18,4], index: 0, kind: input, shape index: {}]   ;;  %s3519_s1 = inlined_call_operand.vmem [shape: f32[9,4], index: 1, kind: input, shape index: {}]   ;;  %s3520_s2 = inlined_call_operand.vmem [shape: f32[1,4], index: 2, kind: input, shape index: {}]   ;;  %s3521_s3 = inlined_call_operand.vmem [shape: f32[1,4], index: 3, kind: input, shape index: {}]   ;;  %s3522_s4 = inlined_call_operand.vmem [shape: bf16[4,8], index: 4, kind: input, shape index: {}]   ;;  %s3523_s5 = inlined_call_operand.vmem [shape: f32[1,8], index: 5, kind: input, shape index: {}]   ;;  %s3524_s6 = inlined_call_operand.vmem [shape: f32[1,8], index: 6, kind: input, shape index: {}]   ;;  %s3525_s7 = inlined_call_operand.vmem [shape: f32[2,16,16,8], index: 7, kind: output, shape index: {}]  }
   0x1   :  { %s2401_s26 = smov 0   ;;  %s2403_s27 = smov 0  }
   0x2   :  { %s2405_s28 = smov 0  }
   0x3 LB: > { %s26_s29 = sadd.s32 1, %s2347_s26  ;;  %s29_s30 = sadd.s32 1, %s2351_s27  ;;  %s2355_s28 = sphi %s2405_s28, %s17_s28   ;;  %s2351_s27 = sphi %s2403_s27, %s3598_s27   ;;  %s2347_s26 = sphi %s2401_s26, %s3597_s26   ;;  %s2343_s25 = sphi %s2399_s25, %s3596_s25   ;;  %s2339_s24 = sphi %s2397_s24, %s3595_s24  }
   0x4   : > { %p27_p0 = scmp.ge.s32.totalorder %s26_s29, 2  ;;  %p2087_p1 = scmp.ge.s32.totalorder %s2355_s28, 1 }
   0x5   : > { %p251_p2 = scmp.lt.s32.totalorder %s2355_s28, 5 }
   0x6   : > { %s3600_s29 = smov (%p27_p0, %s26_s29), 0  ;;  %s3602_s30 = smov (!%p27_p0, %s29_s30), %s2351_s27 }
   0x7   : > { %p252_p3 = pnand %p2087_p1, %p251_p2  ;;  %p31_p4 = scmp.ge.s32.totalorder %s3602_s30, 2 }
   0x9   : > { %s3604_s30 = smov (%p31_p4, %s3602_s30), 0  ;;  %255 = sbr.rel (%p252_p3) target bundleno = 439 (0x1b7), region = 48 }
   0xe   : > { %v1535_v0 = vld [vmem:[%s3522_s4] sm:$0x3]  ;;  %vm1561_vm0 = vcmask 1041408   ;;  %p288_p5 = scmp.lt.s32.totalorder %s2343_s25, 1  ;;  %s2094_s12 = smul.u32 192, %s2339_s24  ;;  %vm422_vm1 = vcmask 1046528  }
   0xf   : > { %v1563_v1 = vsel %vm1561_vm0, %v1535_v0, 0  ;;  %v338_v2 = vld [vmem:[%s3519_s1] sm:$0xff]  ;;  %vm544_vm2 = vcmask 1045504   ;;  %v2510_v54 = vld [vmem:[%s3519_s1 + $0x8] ss:$0 sm:$0xff]  ;;  %vm1536_vm11 = vcmask 31744  }
  0x10   : > { %1572 = vmatpush.bf16.msra.mxu0 %v1563_v1  ;;  %2137 = vmatpush.bf16.msra.mxu1 %v1563_v1  ;;  %s3606_s25 = smov (!%p288_p5, %s2343_s25), 1  ;;  %v2439_v3 = vperm.slane %v338_v2, 0  ;;  %v2441_v4 = vperm.slane %v338_v2, 1  ;;  %v2446_v5 = vperm.slane %v338_v2, 2  ;;  %v2450_v6 = vperm.slane %v338_v2, 3  ;;  %s2089_s18 = sshll.u32 %s2339_s24, 3 }
  0x11   : > { %2138 = vmatpush.bf16.msra.mxu2 %v1563_v1  ;;  %2139 = vmatpush.bf16.msra.mxu3 %v1563_v1  ;;  %s2140_s13 = smul.u32 432, %s3606_s25  ;;  %v2452_v7 = vperm.slane %v338_v2, 4  ;;  %v2454_v8 = vperm.slane %v338_v2, 5  ;;  %v2459_v12 = vperm.slane %v338_v2, 6  ;;  %v2461_v13 = vperm.slane %v338_v2, 7  ;;  %p3355_p6 = scmp.lt.s32.totalorder %s2089_s18, 15 }
  0x12   : > { %s2091_s20 = sshll.u32 %s3606_s25, 5 }
  0x13   : > { %s292_s16 = scalar_lea.vmem %s3518_s0, %s2140_s13  ;;  %s3608_s18 = smov (!%p3355_p6, %s2089_s18), 15 }
  0x14   : > { %s2448_s17 = scalar_lea.vmem %s292_s16, %s2094_s12  ;;  %s2090_s24 = sshll.u32 %s3608_s18, 1 }
  0x15   : > { %v308_v9 = vld [vmem:[%s2448_s17] sm:$0xff]  ;;  %v309_v10 = vld [vmem:[%s2448_s17 + $0x8] sm:$0xff]  ;;  %v310_v11 = vld [vmem:[%s2448_s17 + $0x10] sm:$0x3]  ;;  %s300_s21 = sadd.s32 %s2091_s20, %s2090_s24 }
  0x16   : > { %v2464_v14 = vld [vmem:[%s2448_s17 + $0x18] sm:$0xff]  ;;  %v2467_v15 = vld [vmem:[%s2448_s17 + $0x20] sm:$0xff]  ;;  %v341_v16 = vmul.f32 %v2439_v3, %v308_v9  ;;  %v342_v17 = vmul.f32 %v2439_v3, %v309_v10  ;;  %v374_v18 = vmul.f32 %v2441_v4, %v308_v9  ;;  %v375_v19 = vmul.f32 %v2441_v4, %v309_v10  ;;  %v2474_v20 = vld [vmem:[%s2448_s17 + $0x28] sm:$0x3]  ;;  %s2092_s25 = sshll.u32 %s300_s21, 3 }
  0x17   : > { %v376_v21 = vmul.f32 %v2441_v4, %v310_v11  ;;  %v496_v22 = vmul.f32 %v2446_v5, %v308_v9  ;;  %v497_v23 = vmul.f32 %v2446_v5, %v309_v10  ;;  %v498_v24 = vmul.f32 %v2446_v5, %v310_v11  ;;  %v2495_v45 = vld [vmem:[%s2448_s17 + $0x30] sm:$0xff]  ;;  %v2513_v55 = vld [vmem:[%s2448_s17 + $0x38] sm:$0xff]  ;;  %v2516_v60 = vld [vmem:[%s2448_s17 + $0x40] sm:$0x3]  ;;  %s3378_s8 = scalar_lea.vmem %s3525_s7, %s2092_s25 }
  0x18   : > { %v423_v25 = vrot.slane %v374_v18, 1  ;;  %v424_v26 = vrot.slane %v375_v19, 1  ;;  %v618_v27 = vmul.f32 %v2450_v6, %v2464_v14  ;;  %v619_v28 = vmul.f32 %v2450_v6, %v2467_v15 }
  0x19   : > { %v426_v29 = vrot.slane %v376_v21, 1  ;;  %v545_v30 = vrot.slane %v496_v22, 2  ;;  %v546_v31 = vrot.slane %v497_v23, 2  ;;  %v548_v32 = vrot.slane %v498_v24, 2 }
  0x1a   : > { %v425_v33 = vsel %vm422_vm1, %v423_v25, %v424_v26  ;;  %v651_v34 = vmul.f32 %v2452_v7, %v2464_v14  ;;  %v652_v35 = vmul.f32 %v2452_v7, %v2467_v15  ;;  %v653_v36 = vmul.f32 %v2452_v7, %v2474_v20 }
  0x1b   : > { %v427_v37 = vsel %vm422_vm1, %v424_v26, %v426_v29  ;;  %v479_v38 = vadd.f32 %v425_v33, %v341_v16  ;;  %v547_v39 = vsel %vm544_vm2, %v545_v30, %v546_v31  ;;  %v549_v40 = vsel %vm544_vm2, %v546_v31, %v548_v32 }
  0x1c   : > { %v480_v41 = vadd.f32 %v427_v37, %v342_v17  ;;  %v699_v42 = vrot.slane %v651_v34, 1  ;;  %v700_v43 = vrot.slane %v652_v35, 1  ;;  %v702_v44 = vrot.slane %v653_v36, 1 }
  0x1d   : > { %v601_v46 = vadd.f32 %v547_v39, %v479_v38  ;;  %v772_v47 = vmul.f32 %v2454_v8, %v2464_v14  ;;  %v773_v48 = vmul.f32 %v2454_v8, %v2467_v15  ;;  %v774_v49 = vmul.f32 %v2454_v8, %v2474_v20  ;;  %v2549_v39 = vld [vmem:[%s3520_s2] ss:$0 sm:$0xff] }
  0x1e   : > { %v602_v50 = vadd.f32 %v549_v40, %v480_v41  ;;  %v701_v51 = vsel %vm422_vm1, %v699_v42, %v700_v43  ;;  %v703_v52 = vsel %vm422_vm1, %v700_v43, %v702_v44  ;;  %v893_v53 = vmul.f32 %v2459_v12, %v2495_v45  ;;  %v2552_v40 = vld [vmem:[%s2448_s17 + $0x48] sm:$0xff] }
  0x1f   : > { %v634_v56 = vadd.f32 %v618_v27, %v601_v46  ;;  %v820_v57 = vrot.slane %v772_v47, 2  ;;  %v821_v58 = vrot.slane %v773_v48, 2  ;;  %v823_v59 = vrot.slane %v774_v49, 2  ;;  %v2561_v48 = vld [vmem:[%s3521_s3] ss:$0 sm:$0xff]  ;;  %v2564_v49 = vld [vmem:[%s2448_s17 + $0x50] sm:$0xff] }
  0x20   : > { %v635_v61 = vadd.f32 %v619_v28, %v602_v50  ;;  %v894_v62 = vmul.f32 %v2459_v12, %v2513_v55  ;;  %v926_v63 = vmul.f32 %v2461_v13, %v2495_v45  ;;  %v927_v0 = vmul.f32 %v2461_v13, %v2513_v55 }
  0x21   : > { %v755_v1 = vadd.f32 %v701_v51, %v634_v56  ;;  %v822_v2 = vsel %vm544_vm2, %v820_v57, %v821_v58  ;;  %v824_v9 = vsel %vm544_vm2, %v821_v58, %v823_v59  ;;  %v928_v10 = vmul.f32 %v2461_v13, %v2516_v60 }
  0x22   : > { %v756_v11 = vadd.f32 %v703_v52, %v635_v61  ;;  %v974_v16 = vrot.slane %v926_v63, 1  ;;  %v975_v17 = vrot.slane %v927_v0, 1  ;;  %v1047_v18 = vmul.f32 %v2510_v54, %v2495_v45 }
  0x23   : > { %v876_v19 = vadd.f32 %v822_v2, %v755_v1  ;;  %v977_v21 = vrot.slane %v928_v10, 1  ;;  %v1048_v22 = vmul.f32 %v2510_v54, %v2513_v55  ;;  %v1049_v23 = vmul.f32 %v2510_v54, %v2516_v60  ;;  %v2577_v1 = vld [vmem:[%s2448_s17 + $0x58] sm:$0x3] }
  0x24   : > { %v877_v24 = vadd.f32 %v824_v9, %v756_v11  ;;  %v976_v25 = vsel %vm422_vm1, %v974_v16, %v975_v17  ;;  %v1095_v26 = vrot.slane %v1047_v18, 2  ;;  %v345_v27 = vmul.f32 %v2439_v3, %v2495_v45 }
  0x25   : > { %v909_v28 = vadd.f32 %v893_v53, %v876_v19  ;;  %v978_v29 = vsel %vm422_vm1, %v975_v17, %v977_v21  ;;  %v1096_v30 = vrot.slane %v1048_v22, 2  ;;  %v1098_v31 = vrot.slane %v1049_v23, 2 }
  0x26   : > { %v910_v32 = vadd.f32 %v894_v62, %v877_v24  ;;  %v346_v33 = vmul.f32 %v2439_v3, %v2513_v55  ;;  %v380_v34 = vmul.f32 %v2441_v4, %v2495_v45  ;;  %v381_v35 = vmul.f32 %v2441_v4, %v2513_v55 }
  0x27   : > { %v1030_v36 = vadd.f32 %v976_v25, %v909_v28  ;;  %v1097_v37 = vsel %vm544_vm2, %v1095_v26, %v1096_v30  ;;  %v1099_v38 = vsel %vm544_vm2, %v1096_v30, %v1098_v31  ;;  %v382_v41 = vmul.f32 %v2441_v4, %v2516_v60 }
  0x28   : > { %v1031_v42 = vadd.f32 %v978_v29, %v910_v32  ;;  %v433_v43 = vrot.slane %v380_v34, 1  ;;  %v434_v44 = vrot.slane %v381_v35, 1  ;;  %v502_v46 = vmul.f32 %v2446_v5, %v2495_v45  ;;  %v2602_v34 = vld [vmem:[%s2448_s17 + $0x60] sm:$0xff] }
  0x29   : > { %v1151_v47 = vadd.f32 %v1097_v37, %v1030_v36  ;;  %v436_v50 = vrot.slane %v382_v41, 1  ;;  %v503_v51 = vmul.f32 %v2446_v5, %v2513_v55  ;;  %v504_v52 = vmul.f32 %v2446_v5, %v2516_v60 }
  0x2a   : > { %v1152_v53 = vadd.f32 %v1099_v38, %v1031_v42  ;;  %v435_v56 = vsel %vm422_vm1, %v433_v43, %v434_v44  ;;  %v555_v57 = vrot.slane %v502_v46, 2  ;;  %v622_v58 = vmul.f32 %v2450_v6, %v2552_v40  ;;  %v2608_v38 = vld [vmem:[%s2448_s17 + $0x68] sm:$0xff]  ;;  %v2614_v46 = vld [vmem:[%s2448_s17 + $0x70] sm:$0x3] }
  0x2b   : > { %v1171_v59 = vmul.f32 %v2549_v39, %v1151_v47  ;;  %v437_v61 = vsel %vm422_vm1, %v434_v44, %v436_v50  ;;  %v483_v62 = vadd.f32 %v435_v56, %v345_v27  ;;  %v556_v63 = vrot.slane %v503_v51, 2 }
  0x2c   : > { %v1172_v0 = vmul.f32 %v2549_v39, %v1152_v53  ;;  %v484_v2 = vadd.f32 %v437_v61, %v346_v33  ;;  %v558_v9 = vrot.slane %v504_v52, 2  ;;  %v623_v10 = vmul.f32 %v2450_v6, %v2564_v49 }
  0x2d   : > { %v2582_v11 = vadd.f32 %v2561_v48, %v1171_v59  ;;  %v557_v16 = vsel %vm544_vm2, %v555_v57, %v556_v63  ;;  %v657_v17 = vmul.f32 %v2452_v7, %v2552_v40  ;;  %v658_v18 = vmul.f32 %v2452_v7, %v2564_v49 }
  0x2e   : > { %v2590_v19 = vadd.f32 %v2561_v48, %v1172_v0  ;;  %v559_v21 = vsel %vm544_vm2, %v556_v63, %v558_v9  ;;  %v605_v22 = vadd.f32 %v557_v16, %v483_v62  ;;  %v659_v25 = vmul.f32 %v2452_v7, %v2577_v1 }
  0x2f   : > { %v2095_v23 = vmul.f32 -1.442695, %v2582_v11  ;;  %v606_v24 = vadd.f32 %v559_v21, %v484_v2  ;;  %v709_v26 = vrot.slane %v657_v17, 1  ;;  %v710_v29 = vrot.slane %v658_v18, 1 }
  0x30   : > { %v2096_v27 = vmul.f32 -1.442695, %v2590_v19  ;;  %v638_v28 = vadd.f32 %v622_v58, %v605_v22  ;;  %v778_v30 = vmul.f32 %v2454_v8, %v2552_v40  ;;  %v712_v32 = vrot.slane %v659_v25, 1 }
  0x31   : > { %2186 = vpow2.f32 %v2095_v23  ;;  %v639_v31 = vadd.f32 %v623_v10, %v606_v24  ;;  %v779_v33 = vmul.f32 %v2454_v8, %v2564_v49  ;;  %v711_v35 = vsel %vm422_vm1, %v709_v26, %v710_v29 }
  0x32   : > { %2188 = vpow2.f32 %v2096_v27  ;;  %v780_v36 = vmul.f32 %v2454_v8, %v2577_v1  ;;  %v830_v37 = vrot.slane %v778_v30, 2  ;;  %v713_v41 = vsel %vm422_vm1, %v710_v29, %v712_v32 }
  0x33   : > { %v759_v42 = vadd.f32 %v711_v35, %v638_v28  ;;  %v831_v43 = vrot.slane %v779_v33, 2  ;;  %v897_v44 = vmul.f32 %v2459_v12, %v2602_v34  ;;  %v760_v47 = vadd.f32 %v713_v41, %v639_v31 }
  0x34   : > { %v833_v50 = vrot.slane %v780_v36, 2  ;;  %v898_v51 = vmul.f32 %v2459_v12, %v2608_v38  ;;  %v932_v52 = vmul.f32 %v2461_v13, %v2602_v34  ;;  %v933_v56 = vmul.f32 %v2461_v13, %v2608_v38 }
  0x35   : > { %v832_v53 = vsel %vm544_vm2, %v830_v37, %v831_v43  ;;  %v934_v57 = vmul.f32 %v2461_v13, %v2614_v46  ;;  %v1053_v58 = vmul.f32 %v2510_v54, %v2602_v34  ;;  %v1054_v63 = vmul.f32 %v2510_v54, %v2608_v38 }
  0x36   : > { %v834_v59 = vsel %vm544_vm2, %v831_v43, %v833_v50  ;;  %v880_v61 = vadd.f32 %v832_v53, %v759_v42  ;;  %v984_v62 = vrot.slane %v932_v52, 1  ;;  %v985_v9 = vrot.slane %v933_v56, 1 }
  0x37   : > { %v2187_v0 = vpop.eup %2186  ;;  %v881_v2 = vadd.f32 %v834_v59, %v760_v47  ;;  %v987_v10 = vrot.slane %v934_v57, 1  ;;  %v1055_v16 = vmul.f32 %v2510_v54, %v2614_v46  ;;  %v1105_v22 = vrot.slane %v1053_v58, 2 }
  0x38   : > { %v2189_v17 = vpop.eup %2188  ;;  %v1255_v18 = vadd.f32 1.0, %v2187_v0  ;;  %v913_v21 = vadd.f32 %v897_v44, %v880_v61  ;;  %v1106_v23 = vrot.slane %v1054_v63, 2  ;;  %v986_v26 = vsel %vm422_vm1, %v984_v62, %v985_v9 }
  0x39   : > { %v1256_v24 = vadd.f32 1.0, %v2189_v17  ;;  %v914_v25 = vadd.f32 %v898_v51, %v881_v2  ;;  %v988_v27 = vsel %vm422_vm1, %v985_v9, %v987_v10  ;;  %v1108_v41 = vrot.slane %v1055_v16, 2 }
  0x3a   : > { %2190 = vrcp.f32 %v1255_v18  ;;  %v1282_v28 = vand.u32 2147483648, %v1255_v18  ;;  %vm1276_vm3 = vweird.f32 %v1255_v18  ;;  %v1280_v29 = vand.u32 2147483647, %v1255_v18 }
  0x3b   : > { %2192 = vrcp.f32 %v1256_v24  ;;  %v1297_v30 = vand.u32 2147483648, %v1256_v24  ;;  %vm1291_vm4 = vweird.f32 %v1256_v24  ;;  %v1295_v31 = vand.u32 2147483647, %v1256_v24 }
  0x3c   : > { %v1034_v32 = vadd.f32 %v986_v26, %v913_v21  ;;  %v1035_v33 = vadd.f32 %v988_v27, %v914_v25  ;;  %v1283_v35 = vor.u32 1.1754944e-38, %v1282_v28  ;;  %v1107_v37 = vsel %vm544_vm2, %v1105_v22, %v1106_v23 }
  0x3d   : > { %v2634_v36 = vor.u32 1.1754944e-38, %v1297_v30  ;;  %v349_v43 = vmul.f32 %v2439_v3, %v2602_v34  ;;  %v350_v44 = vmul.f32 %v2439_v3, %v2608_v38  ;;  %v386_v47 = vmul.f32 %v2441_v4, %v2602_v34  ;;  %v2674_v30 = vld [vmem:[%s2448_s17 + $0x78] sm:$0xff] }
  0x3e   : > { %v1155_v42 = vadd.f32 %v1107_v37, %v1034_v32  ;;  %vm2643_vm5 = vcmp.eq.f32.partialorder %v1280_v29, 8.507059e+37  ;;  %v1109_v51 = vsel %vm544_vm2, %v1106_v23, %v1108_v41  ;;  %v387_v52 = vmul.f32 %v2441_v4, %v2608_v38 }
  0x3f   : > { %v388_v53 = vmul.f32 %v2441_v4, %v2614_v46  ;;  %v508_v56 = vmul.f32 %v2446_v5, %v2602_v34  ;;  %vm2654_vm6 = vcmp.eq.f32.partialorder %v1295_v31, 8.507059e+37  ;;  %v1156_v59 = vadd.f32 %v1109_v51, %v1035_v33  ;;  %v2677_v31 = vld [vmem:[%s2448_s17 + $0x80] sm:$0xff] }
  0x40   : > { %v2191_v57 = vpop.eup %2190  ;;  %v1175_v61 = vmul.f32 %v2549_v39, %v1155_v42  ;;  %v443_v62 = vrot.slane %v386_v47, 1  ;;  %v509_v63 = vmul.f32 %v2446_v5, %v2608_v38  ;;  %v444_v9 = vrot.slane %v387_v52, 1 }
  0x41   : > { %v2193_v0 = vpop.eup %2192  ;;  %v1272_v2 = vmul.f32 %v2191_v57, %v1255_v18  ;;  %vm1277_vm7 = vweird.f32 %v2191_v57  ;;  %v446_v10 = vrot.slane %v388_v53, 1  ;;  %v1176_v17 = vmul.f32 %v2549_v39, %v1156_v59 }
  0x42   : > { %v1287_v16 = vmul.f32 %v2193_v0, %v1256_v24  ;;  %vm1292_vm8 = vweird.f32 %v2193_v0  ;;  %v2663_v21 = vadd.f32 %v2561_v48, %v1175_v61  ;;  %v445_v23 = vsel %vm422_vm1, %v443_v62, %v444_v9  ;;  %vm2681_vm9 = vmor %vm1276_vm3, %vm1277_vm7 }
  0x43   : > { %v1273_v22 = vsub.f32 1.0, %v1272_v2  ;;  %v447_v25 = vsel %vm422_vm1, %v444_v9, %v446_v10  ;;  %v510_v26 = vmul.f32 %v2446_v5, %v2614_v46  ;;  %v2670_v28 = vadd.f32 %v2561_v48, %v1176_v17  ;;  %vm2688_vm10 = vmor %vm1291_vm4, %vm1292_vm8 }
  0x44   : > { %v1288_v27 = vsub.f32 1.0, %v1287_v16  ;;  %v2099_v29 = vmul.f32 -1.442695, %v2663_v21  ;;  %v487_v32 = vadd.f32 %v445_v23, %v349_v43  ;;  %v488_v37 = vadd.f32 %v447_v25, %v350_v44  ;;  %v2693_v44 = vld [vmem:[%s2448_s17 + $0x88] sm:$0x3] }
  0x45   : > { %v1274_v33 = vmul.f32 %v2191_v57, %v1273_v22  ;;  %v565_v41 = vrot.slane %v508_v56, 2  ;;  %v566_v42 = vrot.slane %v509_v63, 2  ;;  %v2100_v52 = vmul.f32 -1.442695, %v2670_v28 }
  0x46   : > { %v1289_v51 = vmul.f32 %v2193_v0, %v1288_v27  ;;  %2194 = vpow2.f32 %v2099_v29  ;;  %v568_v53 = vrot.slane %v510_v26, 2  ;;  %v626_v56 = vmul.f32 %v2450_v6, %v2674_v30 }
  0x47   : > { %v1275_v59 = vadd.f32 %v2191_v57, %v1274_v33  ;;  %v567_v18 = vsel %vm544_vm2, %v565_v41, %v566_v42  ;;  %v627_v61 = vmul.f32 %v2450_v6, %v2677_v31  ;;  %2196 = vpow2.f32 %v2100_v52 }
  0x48   : > { %v1290_v62 = vadd.f32 %v2193_v0, %v1289_v51  ;;  %v569_v63 = vsel %vm544_vm2, %v566_v42, %v568_v53  ;;  %v609_v2 = vadd.f32 %v567_v18, %v487_v32  ;;  %v663_v10 = vmul.f32 %v2452_v7, %v2674_v30 }
  0x49   : > { %v1279_v24 = vsel %vm2681_vm9, %v2191_v57, %v1275_v59  ;;  %v610_v9 = vadd.f32 %v569_v63, %v488_v37  ;;  %v664_v16 = vmul.f32 %v2452_v7, %v2677_v31  ;;  %v665_v23 = vmul.f32 %v2452_v7, %v2693_v44  ;;  %v2735_v59 = vld [vmem:[%s2448_s17 + $0x90] sm:$0xff] }
  0x4a   : > { %v1284_v17 = vsel %vm2643_vm5, %v1283_v35, %v1279_v24  ;;  %v1294_v22 = vsel %vm2688_vm10, %v2193_v0, %v1290_v62  ;;  %v642_v26 = vadd.f32 %v626_v56, %v609_v2  ;;  %v719_v27 = vrot.slane %v663_v10, 1  ;;  %v2745_v2 = vld [vmem:[%s2448_s17 + $0x98] sm:$0xff] }
  0x4b   : > { %v1299_v57 = vsel %vm2654_vm6, %v2634_v36, %v1294_v22  ;;  %v1511_v25 = vmul.f32 %v1284_v17, %v2582_v11  ;;  %v720_v50 = vrot.slane %v664_v16, 1  ;;  %v722_v35 = vrot.slane %v665_v23, 1  ;;  %v2749_v16 = vld [vmem:[%s2448_s17 + $0xa0] sm:$0x3] }
  0x4c   : > { %v2195_v29 = vpop.eup %2194  ;;  %v1512_v32 = vmul.f32 %v1299_v57, %v2590_v19  ;;  %v784_v0 = vmul.f32 %v2454_v8, %v2674_v30  ;;  %v643_v37 = vadd.f32 %v627_v61, %v610_v9  ;;  %v785_v58 = vmul.f32 %v2454_v8, %v2677_v31  ;;  %v2826_v57 = vld [vmem:[%s2448_s17 + $0xa8] sm:$0xff] }
  0x4d   : > { %v2720_v33 = vadd.f32 1.0, %v2195_v29  ;;  %v786_v11 = vmul.f32 %v2454_v8, %v2693_v44  ;;  %v2197_v36 = vpop.eup %2196  ;;  %v721_v42 = vsel %vm422_vm1, %v719_v27, %v720_v50  ;;  %v723_v19 = vsel %vm422_vm1, %v720_v50, %v722_v35 }
  0x4e   : > { %v1527_v41 = vpack.c.bf16 %v1512_v32, %v1511_v25  ;;  %v840_v47 = vrot.slane %v784_v0, 2  ;;  %v2728_v51 = vadd.f32 1.0, %v2197_v36  ;;  %v763_v43 = vadd.f32 %v721_v42, %v642_v26 }
  0x4f   : > { %2198 = vrcp.f32 %v2720_v33  ;;  %v1340_v52 = vand.u32 2147483647, %v2720_v33  ;;  %v1342_v53 = vand.u32 2147483648, %v2720_v33  ;;  %v841_v18 = vrot.slane %v785_v58, 2 }
  0x50   : > { %2111 = vmatmul.msk.bf16.vlgmr.msra.gmra.mxu0 %vm1536_vm11, %v1527_v41  ;;  %vm1336_vm12 = vweird.f32 %v2720_v33  ;;  %2200 = vrcp.f32 %v2728_v51  ;;  %v764_v56 = vadd.f32 %v723_v19, %v643_v37  ;;  %v901_v61 = vmul.f32 %v2459_v12, %v2735_v59 }
  0x51   : > { %vm1351_vm13 = vweird.f32 %v2728_v51  ;;  %v1355_v62 = vand.u32 2147483647, %v2728_v51  ;;  %v1357_v63 = vand.u32 2147483648, %v2728_v51  ;;  %v842_v24 = vsel %vm544_vm2, %v840_v47, %v841_v18 }
  0x52   : > { %v843_v9 = vrot.slane %v786_v11, 2  ;;  %v1343_v10 = vor.u32 1.1754944e-38, %v1342_v53  ;;  %v884_v17 = vadd.f32 %v842_v24, %v763_v43  ;;  %v902_v22 = vmul.f32 %v2459_v12, %v2745_v2  ;;  %v2839_v11 = vld [vmem:[%s2448_s17 + $0xb8] sm:$0x3] }
  0x53   : > { %v938_v23 = vmul.f32 %v2461_v13, %v2735_v59  ;;  %vm2755_vm14 = vcmp.eq.f32.partialorder %v1340_v52, 8.507059e+37  ;;  %v1358_v25 = vor.u32 1.1754944e-38, %v1357_v63  ;;  %v939_v27 = vmul.f32 %v2461_v13, %v2745_v2  ;;  %3550 = vst [vmem:[#allocation2_spill] sm:$0xff] %v2839_v11 }
  0x54   : > { %v844_v26 = vsel %vm544_vm2, %v841_v18, %v843_v9  ;;  %v940_v29 = vmul.f32 %v2461_v13, %v2749_v16  ;;  %v917_v35 = vadd.f32 %v901_v61, %v884_v17  ;;  %v1059_v37 = vmul.f32 %v2510_v54, %v2735_v59 }
  0x55   : > { %v2199_v32 = vpop.eup %2198  ;;  %v885_v50 = vadd.f32 %v844_v26, %v764_v56  ;;  %v994_v0 = vrot.slane %v938_v23, 1  ;;  %vm2767_vm0 = vcmp.eq.f32.partialorder %v1355_v62, 8.507059e+37  ;;  %v995_v36 = vrot.slane %v939_v27, 1 }
  0x56   : > { %v1332_v58 = vmul.f32 %v2199_v32, %v2720_v33  ;;  %vm1337_vm15 = vweird.f32 %v2199_v32  ;;  %v997_v41 = vrot.slane %v940_v29, 1  ;;  %v2201_v42 = vpop.eup %2200  ;;  %v1060_v47 = vmul.f32 %v2510_v54, %v2745_v2 }
  0x57   : > { %v918_v19 = vadd.f32 %v902_v22, %v885_v50  ;;  %v1061_v52 = vmul.f32 %v2510_v54, %v2749_v16  ;;  %v1115_v53 = vrot.slane %v1059_v37, 2  ;;  %v1347_v18 = vmul.f32 %v2201_v42, %v2728_v51  ;;  %vm2783_vm4 = vmor %vm1336_vm12, %vm1337_vm15 }
  0x58   : > { %v1333_v43 = vsub.f32 1.0, %v1332_v58  ;;  %vm1352_vm3 = vweird.f32 %v2201_v42  ;;  %v996_v56 = vsel %vm422_vm1, %v994_v0, %v995_v36  ;;  %v998_v61 = vsel %vm422_vm1, %v995_v36, %v997_v41 }
  0x59   : > { %v1038_v62 = vadd.f32 %v996_v56, %v917_v35  ;;  %v1116_v63 = vrot.slane %v1060_v47, 2  ;;  %v1118_v24 = vrot.slane %v1061_v52, 2  ;;  %v1348_v17 = vsub.f32 1.0, %v1347_v18  ;;  %vm2796_vm5 = vmor %vm1351_vm13, %vm1352_vm3 }
  0x5a   : > { %v1334_v9 = vmul.f32 %v2199_v32, %v1333_v43  ;;  %v1039_v22 = vadd.f32 %v998_v61, %v918_v19  ;;  %v353_v23 = vmul.f32 %v2439_v3, %v2735_v59  ;;  %v354_v50 = vmul.f32 %v2439_v3, %v2745_v2 }
  0x5b   : > { %v1117_v27 = vsel %vm544_vm2, %v1115_v53, %v1116_v63  ;;  %v1119_v29 = vsel %vm544_vm2, %v1116_v63, %v1118_v24  ;;  %v392_v35 = vmul.f32 %v2441_v4, %v2735_v59  ;;  %v1349_v37 = vmul.f32 %v2201_v42, %v1348_v17 }
  0x5c   : > { %v1335_v0 = vadd.f32 %v2199_v32, %v1334_v9  ;;  %v1159_v58 = vadd.f32 %v1117_v27, %v1038_v62  ;;  %v1160_v36 = vadd.f32 %v1119_v29, %v1039_v22  ;;  %v393_v41 = vmul.f32 %v2441_v4, %v2745_v2  ;;  %v2829_v22 = vld [vmem:[%s2448_s17 + $0xb0] sm:$0xff] }
  0x5d   : > { %v394_v19 = vmul.f32 %v2441_v4, %v2749_v16  ;;  %v453_v47 = vrot.slane %v392_v35, 1  ;;  %v514_v52 = vmul.f32 %v2446_v5, %v2735_v59  ;;  %v1350_v51 = vadd.f32 %v2201_v42, %v1349_v37 }
  0x5e   : > { %v1339_v53 = vsel %vm2783_vm4, %v2199_v32, %v1335_v0  ;;  %v1179_v43 = vmul.f32 %v2549_v39, %v1159_v58  ;;  %v1180_v18 = vmul.f32 %v2549_v39, %v1160_v36  ;;  %v454_v61 = vrot.slane %v393_v41, 1 }
  0x5f   : > { %v1344_v56 = vsel %vm2755_vm14, %v1343_v10, %v1339_v53  ;;  %v456_v62 = vrot.slane %v394_v19, 1  ;;  %v515_v63 = vmul.f32 %v2446_v5, %v2745_v2  ;;  %v1354_v24 = vsel %vm2796_vm5, %v2201_v42, %v1350_v51 }
  0x60   : > { %v1515_v9 = vmul.f32 %v1344_v56, %v2663_v21  ;;  %v2818_v32 = vadd.f32 %v2561_v48, %v1179_v43  ;;  %v2821_v17 = vadd.f32 %v2561_v48, %v1180_v18  ;;  %v1359_v10 = vsel %vm2767_vm0, %v1358_v25, %v1354_v24  ;;  %v2855_v43 = vld [vmem:[%s2448_s17 + $0xc0] sm:$0xff] }
  0x61   : > { %v455_v26 = vsel %vm422_vm1, %v453_v47, %v454_v61  ;;  %v457_v27 = vsel %vm422_vm1, %v454_v61, %v456_v62  ;;  %v516_v21 = vmul.f32 %v2446_v5, %v2749_v16  ;;  %v1516_v42 = vmul.f32 %v1359_v10, %v2670_v28  ;;  %3551 = vst [vmem:[#allocation3_spill] sm:$0xff] %v2855_v43 }
  0x62   : > { %v2103_v29 = vmul.f32 -1.442695, %v2818_v32  ;;  %v2104_v35 = vmul.f32 -1.442695, %v2821_v17  ;;  %v491_v0 = vadd.f32 %v455_v26, %v353_v23  ;;  %v492_v25 = vadd.f32 %v457_v27, %v354_v50  ;;  %v2864_v26 = vld [vmem:[%s2448_s17 + $0xc8] sm:$0xff] }
  0x63   : > { %v575_v37 = vrot.slane %v514_v52, 2  ;;  %v576_v58 = vrot.slane %v515_v63, 2  ;;  %v578_v36 = vrot.slane %v516_v21, 2  ;;  %v1529_v33 = vpack.c.bf16 %v1516_v42, %v1515_v9  ;;  %3552 = vst [vmem:[#allocation4_spill] sm:$0xff] %v2864_v26 }
  0x64   : > { %2202 = vpow2.f32 %v2103_v29  ;;  %v630_v41 = vmul.f32 %v2450_v6, %v2826_v57  ;;  %v631_v28 = vmul.f32 %v2450_v6, %v2829_v22  ;;  %v669_v50 = vmul.f32 %v2452_v7, %v2826_v57 }
  0x65   : > { %2204 = vpow2.f32 %v2104_v35  ;;  %v577_v19 = vsel %vm544_vm2, %v575_v37, %v576_v58  ;;  %v579_v23 = vsel %vm544_vm2, %v576_v58, %v578_v36  ;;  %2113 = vmatmul.msk.bf16.vlgmr.msra.gmra.mxu1 %vm1536_vm11, %v1529_v33  ;;  %v670_v53 = vmul.f32 %v2452_v7, %v2829_v22  ;;  %v2867_v35 = vld [vmem:[%s2448_s17 + $0xd0] sm:$0x3] }
  0x66   : > { %v613_v47 = vadd.f32 %v577_v19, %v491_v0  ;;  %v614_v52 = vadd.f32 %v579_v23, %v492_v25  ;;  %v671_v51 = vmul.f32 %v2452_v7, %v2839_v11  ;;  %v729_v18 = vrot.slane %v669_v50, 1  ;;  %3553 = vst [vmem:[#allocation5_spill] sm:$0xff] %v2867_v35 }
  0x67   : > { %v790_v56 = vmul.f32 %v2454_v8, %v2826_v57  ;;  %v791_v61 = vmul.f32 %v2454_v8, %v2829_v22  ;;  %v792_v62 = vmul.f32 %v2454_v8, %v2839_v11  ;;  %v730_v9 = vrot.slane %v670_v53, 1 }
  0x68   : > { %v646_v63 = vadd.f32 %v630_v41, %v613_v47  ;;  %v647_v24 = vadd.f32 %v631_v28, %v614_v52  ;;  %v732_v10 = vrot.slane %v671_v51, 1  ;;  %v905_v37 = vmul.f32 %v2459_v12, %v2855_v43 }
  0x69   : > { %v850_v27 = vrot.slane %v790_v56, 2  ;;  %v851_v21 = vrot.slane %v791_v61, 2  ;;  %v853_v42 = vrot.slane %v792_v62, 2  ;;  %v731_v0 = vsel %vm422_vm1, %v729_v18, %v730_v9 }
  0x6a   : > { %v2203_v29 = vpop.eup %2202  ;;  %v733_v25 = vsel %vm422_vm1, %v730_v9, %v732_v10  ;;  %v767_v33 = vadd.f32 %v731_v0, %v646_v63  ;;  %v944_v28 = vmul.f32 %v2461_v13, %v2855_v43  ;;  %v945_v47 = vmul.f32 %v2461_v13, %v2864_v26 }
  0x6b   : > { %v2205_v58 = vpop.eup %2204  ;;  %v1263_v36 = vadd.f32 1.0, %v2203_v29  ;;  %v768_v41 = vadd.f32 %v733_v25, %v647_v24  ;;  %v852_v23 = vsel %vm544_vm2, %v850_v27, %v851_v21  ;;  %v854_v50 = vsel %vm544_vm2, %v851_v21, %v853_v42 }
  0x6c   : > { %v1264_v19 = vadd.f32 1.0, %v2205_v58  ;;  %v906_v53 = vmul.f32 %v2459_v12, %v2864_v26  ;;  %v946_v51 = vmul.f32 %v2461_v13, %v2867_v35  ;;  %v888_v62 = vadd.f32 %v852_v23, %v767_v33 }
  0x6d   : > { %2206 = vrcp.f32 %v1263_v36  ;;  %v1402_v52 = vand.u32 2147483648, %v1263_v36  ;;  %vm1396_vm6 = vweird.f32 %v1263_v36  ;;  %v1400_v18 = vand.u32 2147483647, %v1263_v36 }
  0x6e   : > { %2208 = vrcp.f32 %v1264_v19  ;;  %v1417_v56 = vand.u32 2147483648, %v1264_v19  ;;  %vm1411_vm7 = vweird.f32 %v1264_v19  ;;  %v1415_v61 = vand.u32 2147483647, %v1264_v19 }
  0x6f   : > { %v889_v63 = vadd.f32 %v854_v50, %v768_v41  ;;  %v1403_v24 = vor.u32 1.1754944e-38, %v1402_v52  ;;  %v1004_v10 = vrot.slane %v944_v28, 1  ;;  %v1005_v27 = vrot.slane %v945_v47, 1 }
  0x70   : > { %v1418_v9 = vor.u32 1.1754944e-38, %v1417_v56  ;;  %v921_v21 = vadd.f32 %v905_v37, %v888_v62  ;;  %v1007_v29 = vrot.slane %v946_v51, 1  ;;  %v1065_v0 = vmul.f32 %v2510_v54, %v2855_v43 }
  0x71   : > { %v922_v42 = vadd.f32 %v906_v53, %v889_v63  ;;  %vm2885_vm8 = vcmp.eq.f32.partialorder %v1400_v18, 8.507059e+37  ;;  %v1006_v58 = vsel %vm422_vm1, %v1004_v10, %v1005_v27  ;;  %v1066_v33 = vmul.f32 %v2510_v54, %v2864_v26 }
  0x72   : > { %v1067_v41 = vmul.f32 %v2510_v54, %v2867_v35  ;;  %v343_v37 = vmul.f32 %v2439_v3, %v2464_v14  ;;  %vm2896_vm9 = vcmp.eq.f32.partialorder %v1415_v61, 8.507059e+37  ;;  %v1008_v50 = vsel %vm422_vm1, %v1005_v27, %v1007_v29 }
  0x73   : > { %v2207_v28 = vpop.eup %2206  ;;  %v1042_v47 = vadd.f32 %v1006_v58, %v921_v21  ;;  %v1125_v52 = vrot.slane %v1065_v0, 2  ;;  %v344_v53 = vmul.f32 %v2439_v3, %v2467_v15  ;;  %v1043_v56 = vadd.f32 %v1008_v50, %v922_v42 }
  0x74   : > { %v2209_v51 = vpop.eup %2208  ;;  %v1392_v18 = vmul.f32 %v2207_v28, %v1263_v36  ;;  %vm1397_vm10 = vweird.f32 %v2207_v28  ;;  %v1126_v62 = vrot.slane %v1066_v33, 2  ;;  %v1128_v10 = vrot.slane %v1067_v41, 2 }
  0x75   : > { %v1407_v63 = vmul.f32 %v2209_v51, %v1264_v19  ;;  %vm1412_vm12 = vweird.f32 %v2209_v51  ;;  %v377_v61 = vmul.f32 %v2441_v4, %v2464_v14  ;;  %v378_v27 = vmul.f32 %v2441_v4, %v2467_v15  ;;  %vm2913_vm13 = vmor %vm1396_vm6, %vm1397_vm10 }
  0x76   : > { %v1393_v35 = vsub.f32 1.0, %v1392_v18  ;;  %v1127_v26 = vsel %vm544_vm2, %v1125_v52, %v1126_v62  ;;  %v379_v21 = vmul.f32 %v2441_v4, %v2474_v20  ;;  %v1129_v0 = vsel %vm544_vm2, %v1126_v62, %v1128_v10  ;;  %vm2924_vm14 = vmor %vm1411_vm7, %vm1412_vm12 }
  0x77   : > { %v1408_v29 = vsub.f32 1.0, %v1407_v63  ;;  %v1163_v42 = vadd.f32 %v1127_v26, %v1042_v47  ;;  %v428_v58 = vrot.slane %v377_v61, 1  ;;  %v1164_v50 = vadd.f32 %v1129_v0, %v1043_v56 }
  0x78   : > { %v1394_v33 = vmul.f32 %v2207_v28, %v1393_v35  ;;  %v429_v41 = vrot.slane %v378_v27, 1  ;;  %v431_v43 = vrot.slane %v379_v21, 1  ;;  %v499_v63 = vmul.f32 %v2446_v5, %v2464_v14 }
  0x79   : > { %v1409_v52 = vmul.f32 %v2209_v51, %v1408_v29  ;;  %v1183_v11 = vmul.f32 %v2549_v39, %v1163_v42  ;;  %v500_v26 = vmul.f32 %v2446_v5, %v2467_v15  ;;  %v1184_v36 = vmul.f32 %v2549_v39, %v1164_v50 }
  0x7a   : > { %v1395_v47 = vadd.f32 %v2207_v28, %v1394_v33  ;;  %v430_v56 = vsel %vm422_vm1, %v428_v58, %v429_v41  ;;  %v432_v62 = vsel %vm422_vm1, %v429_v41, %v431_v43  ;;  %v501_v21 = vmul.f32 %v2446_v5, %v2474_v20 }
  0x7b   : > { %v1410_v10 = vadd.f32 %v2209_v51, %v1409_v52  ;;  %v2932_v61 = vadd.f32 %v2561_v48, %v1183_v11  ;;  %v481_v14 = vadd.f32 %v430_v56, %v343_v37  ;;  %v482_v27 = vadd.f32 %v432_v62, %v344_v53 }
  0x7c   : > { %v1399_v15 = vsel %vm2913_vm13, %v2207_v28, %v1395_v47  ;;  %v2937_v19 = vadd.f32 %v2561_v48, %v1184_v36  ;;  %v550_v29 = vrot.slane %v499_v63, 2  ;;  %v551_v37 = vrot.slane %v500_v26, 2 }
  0x7d   : > { %v1404_v0 = vsel %vm2885_vm8, %v1403_v24, %v1399_v15  ;;  %v1414_v43 = vsel %vm2924_vm14, %v2209_v51, %v1410_v10  ;;  %v2107_v11 = vmul.f32 -1.442695, %v2932_v61  ;;  %v553_v58 = vrot.slane %v501_v21, 2 }
  0x7e   : > { %v1419_v53 = vsel %vm2896_vm9, %v1418_v9, %v1414_v43  ;;  %v1519_v28 = vmul.f32 %v1404_v0, %v2818_v32  ;;  %v2108_v42 = vmul.f32 -1.442695, %v2937_v19  ;;  %v552_v25 = vsel %vm544_vm2, %v550_v29, %v551_v37 }
  0x7f   : > { %v1520_v20 = vmul.f32 %v1419_v53, %v2821_v17  ;;  %2210 = vpow2.f32 %v2107_v11  ;;  %v620_v24 = vmul.f32 %v2450_v6, %v2495_v45  ;;  %v554_v51 = vsel %vm544_vm2, %v551_v37, %v553_v58 }
  0x80   : > { %2212 = vpow2.f32 %v2108_v42  ;;  %v603_v33 = vadd.f32 %v552_v25, %v481_v14  ;;  %v621_v9 = vmul.f32 %v2450_v6, %v2513_v55  ;;  %v604_v32 = vadd.f32 %v554_v51, %v482_v27 }
  0x81   : > { %v1531_v23 = vpack.c.bf16 %v1520_v20, %v1519_v28  ;;  %v654_v50 = vmul.f32 %v2452_v7, %v2495_v45  ;;  %v655_v17 = vmul.f32 %v2452_v7, %v2513_v55  ;;  %v656_v18 = vmul.f32 %v2452_v7, %v2516_v60 }
  0x82   : > { %v636_v41 = vadd.f32 %v620_v24, %v603_v33  ;;  %v775_v52 = vmul.f32 %v2454_v8, %v2495_v45  ;;  %v776_v63 = vmul.f32 %v2454_v8, %v2513_v55  ;;  %v637_v26 = vadd.f32 %v621_v9, %v604_v32 }
  0x83   : > { %2115 = vmatmul.msk.bf16.vlgmr.msra.gmra.mxu2 %vm1536_vm11, %v1531_v23  ;;  %v704_v47 = vrot.slane %v654_v50, 1  ;;  %v705_v35 = vrot.slane %v655_v17, 1  ;;  %v777_v36 = vmul.f32 %v2454_v8, %v2516_v60  ;;  %v707_v56 = vrot.slane %v656_v18, 1 }
  0x84   : > { %v825_v62 = vrot.slane %v775_v52, 2  ;;  %v826_v10 = vrot.slane %v776_v63, 2  ;;  %v895_v45 = vmul.f32 %v2459_v12, %v2552_v40  ;;  %v929_v43 = vmul.f32 %v2461_v13, %v2552_v40 }
  0x85   : > { %v2211_v14 = vpop.eup %2210  ;;  %v706_v27 = vsel %vm422_vm1, %v704_v47, %v705_v35  ;;  %v828_v15 = vrot.slane %v777_v36, 2  ;;  %v708_v29 = vsel %vm422_vm1, %v705_v35, %v707_v56  ;;  %v896_v42 = vmul.f32 %v2459_v12, %v2564_v49 }
  0x86   : > { %v2213_v21 = vpop.eup %2212  ;;  %v1267_v55 = vadd.f32 1.0, %v2211_v14  ;;  %v757_v0 = vadd.f32 %v706_v27, %v636_v41  ;;  %v758_v60 = vadd.f32 %v708_v29, %v637_v26  ;;  %v827_v37 = vsel %vm544_vm2, %v825_v62, %v826_v10 }
  0x87   : > { %v1268_v11 = vadd.f32 1.0, %v2213_v21  ;;  %v829_v53 = vsel %vm544_vm2, %v826_v10, %v828_v15  ;;  %v930_v58 = vmul.f32 %v2461_v13, %v2564_v49  ;;  %v931_v32 = vmul.f32 %v2461_v13, %v2577_v1 }
  0x88   : > { %2214 = vrcp.f32 %v1267_v55  ;;  %v1462_v28 = vand.u32 2147483648, %v1267_v55  ;;  %vm1456_vm15 = vweird.f32 %v1267_v55  ;;  %v1460_v20 = vand.u32 2147483647, %v1267_v55 }
  0x89   : > { %2216 = vrcp.f32 %v1268_v11  ;;  %v1477_v25 = vand.u32 2147483648, %v1268_v11  ;;  %vm1471_vm0 = vweird.f32 %v1268_v11  ;;  %v1475_v24 = vand.u32 2147483647, %v1268_v11 }
  0x8a   : > { %v878_v51 = vadd.f32 %v827_v37, %v757_v0  ;;  %v879_v33 = vadd.f32 %v829_v53, %v758_v60  ;;  %v1463_v9 = vor.u32 1.1754944e-38, %v1462_v28  ;;  %v979_v50 = vrot.slane %v929_v43, 1 }
  0x8b   : > { %v1478_v23 = vor.u32 1.1754944e-38, %v1477_v25  ;;  %v980_v18 = vrot.slane %v930_v58, 1  ;;  %v1050_v52 = vmul.f32 %v2510_v54, %v2552_v40  ;;  %vm2986_vm3 = vcmp.eq.f32.partialorder %v1460_v20, 8.507059e+37 }
  0x8c   : > { %v911_v17 = vadd.f32 %v895_v45, %v878_v51  ;;  %v912_v41 = vadd.f32 %v896_v42, %v879_v33  ;;  %v982_v26 = vrot.slane %v931_v32, 1  ;;  %v1051_v47 = vmul.f32 %v2510_v54, %v2564_v49 }
  0x8d   : > { %v1052_v35 = vmul.f32 %v2510_v54, %v2577_v1  ;;  %v347_v36 = vmul.f32 %v2439_v3, %v2552_v40  ;;  %vm2996_vm4 = vcmp.eq.f32.partialorder %v1475_v24, 8.507059e+37  ;;  %v981_v10 = vsel %vm422_vm1, %v979_v50, %v980_v18 }
  0x8e   : > { %v2215_v56 = vpop.eup %2214  ;;  %v1100_v14 = vrot.slane %v1050_v52, 2  ;;  %v348_v27 = vmul.f32 %v2439_v3, %v2564_v49  ;;  %v383_v15 = vmul.f32 %v2441_v4, %v2552_v40  ;;  %v983_v54 = vsel %vm422_vm1, %v980_v18, %v982_v26 }
  0x8f   : > { %v2217_v45 = vpop.eup %2216  ;;  %v1452_v21 = vmul.f32 %v2215_v56, %v1267_v55  ;;  %vm1457_vm5 = vweird.f32 %v2215_v56  ;;  %v1032_v29 = vadd.f32 %v981_v10, %v911_v17  ;;  %v1033_v43 = vadd.f32 %v983_v54, %v912_v41 }
  0x90   : > { %v1467_v0 = vmul.f32 %v2217_v45, %v1268_v11  ;;  %vm1472_vm6 = vweird.f32 %v2217_v45  ;;  %v1101_v60 = vrot.slane %v1051_v47, 2  ;;  %v1103_v53 = vrot.slane %v1052_v35, 2  ;;  %vm3016_vm7 = vmor %vm1456_vm15, %vm1457_vm5 }
  0x91   : > { %v1453_v37 = vsub.f32 1.0, %v1452_v21  ;;  %v384_v28 = vmul.f32 %v2441_v4, %v2564_v49  ;;  %v385_v42 = vmul.f32 %v2441_v4, %v2577_v1  ;;  %v438_v25 = vrot.slane %v383_v15, 1  ;;  %vm3024_vm8 = vmor %vm1471_vm0, %vm1472_vm6 }
  0x92   : > { %v1468_v58 = vsub.f32 1.0, %v1467_v0  ;;  %v1102_v20 = vsel %vm544_vm2, %v1100_v14, %v1101_v60  ;;  %v505_v24 = vmul.f32 %v2446_v5, %v2552_v40  ;;  %v1104_v33 = vsel %vm544_vm2, %v1101_v60, %v1103_v53 }
  0x93   : > { %v1454_v51 = vmul.f32 %v2215_v56, %v1453_v37  ;;  %v1153_v32 = vadd.f32 %v1102_v20, %v1032_v29  ;;  %v439_v50 = vrot.slane %v384_v28, 1  ;;  %v1154_v18 = vadd.f32 %v1104_v33, %v1033_v43 }
  0x94   : > { %v1469_v41 = vmul.f32 %v2217_v45, %v1468_v58  ;;  %v441_v52 = vrot.slane %v385_v42, 1  ;;  %v506_v26 = vmul.f32 %v2446_v5, %v2564_v49  ;;  %v507_v10 = vmul.f32 %v2446_v5, %v2577_v1 }
  0x95   : > { %v1455_v47 = vadd.f32 %v2215_v56, %v1454_v51  ;;  %v1173_v35 = vmul.f32 %v2549_v39, %v1153_v32  ;;  %v440_v55 = vsel %vm422_vm1, %v438_v25, %v439_v50  ;;  %v1174_v15 = vmul.f32 %v2549_v39, %v1154_v18 }
  0x96   : > { %v1470_v14 = vadd.f32 %v2217_v45, %v1469_v41  ;;  %v442_v21 = vsel %vm422_vm1, %v439_v50, %v441_v52  ;;  %v485_v49 = vadd.f32 %v440_v55, %v347_v36  ;;  %v560_v0 = vrot.slane %v505_v24, 2 }
  0x97   : > { %v1459_v11 = vsel %vm3016_vm7, %v2215_v56, %v1455_v47  ;;  %v3037_v54 = vadd.f32 %v2561_v48, %v1173_v35  ;;  %v486_v29 = vadd.f32 %v442_v21, %v348_v27  ;;  %v3044_v60 = vadd.f32 %v2561_v48, %v1174_v15 }
  0x98   : > { %v1464_v43 = vsel %vm2986_vm3, %v1463_v9, %v1459_v11  ;;  %v1474_v1 = vsel %vm3024_vm8, %v2217_v45, %v1470_v14  ;;  %v561_v39 = vrot.slane %v506_v26, 2  ;;  %v563_v53 = vrot.slane %v507_v10, 2 }
  0x99   : > { %v1479_v36 = vsel %vm2996_vm4, %v1478_v23, %v1474_v1  ;;  %v1523_v56 = vmul.f32 %v1464_v43, %v2932_v61  ;;  %v2097_v37 = vmul.f32 -1.442695, %v3037_v54  ;;  %v2098_v63 = vmul.f32 -1.442695, %v3044_v60 }
  0x9a   : > { %v1524_v27 = vmul.f32 %v1479_v36, %v2937_v19  ;;  %v562_v9 = vsel %vm544_vm2, %v560_v0, %v561_v39  ;;  %v624_v45 = vmul.f32 %v2450_v6, %v2602_v34  ;;  %v564_v48 = vsel %vm544_vm2, %v561_v39, %v563_v53 }
  0x9b   : > { %2218 = vpow2.f32 %v2097_v37  ;;  %v607_v28 = vadd.f32 %v562_v9, %v485_v49  ;;  %v625_v23 = vmul.f32 %v2450_v6, %v2608_v38  ;;  %v608_v62 = vadd.f32 %v564_v48, %v486_v29 }
  0x9c   : > { %v1533_v61 = vpack.c.bf16 %v1524_v27, %v1523_v56  ;;  %2220 = vpow2.f32 %v2098_v63  ;;  %v660_v19 = vmul.f32 %v2452_v7, %v2602_v34  ;;  %v661_v58 = vmul.f32 %v2452_v7, %v2608_v38 }
  0x9d   : > { %v640_v42 = vadd.f32 %v624_v45, %v607_v28  ;;  %v662_v20 = vmul.f32 %v2452_v7, %v2614_v46  ;;  %v781_v25 = vmul.f32 %v2454_v8, %v2602_v34  ;;  %v641_v24 = vadd.f32 %v625_v23, %v608_v62  ;;  %v3097_v23 = vld [vmem:[%s3519_s1 + $0x8] ss:$0 sm:$0xff] }
  0x9e   : > { %2117 = vmatmul.msk.bf16.vlgmr.msra.gmra.mxu3 %vm1536_vm11, %v1533_v61  ;;  %v714_v51 = vrot.slane %v660_v19, 1  ;;  %v782_v33 = vmul.f32 %v2454_v8, %v2608_v38  ;;  %v783_v32 = vmul.f32 %v2454_v8, %v2614_v46  ;;  %v715_v50 = vrot.slane %v661_v58, 1 }
  0x9f   : > { %v717_v17 = vrot.slane %v662_v20, 1  ;;  %v835_v41 = vrot.slane %v781_v25, 2  ;;  %v935_v26 = vmul.f32 %v2461_v13, %v2674_v30  ;;  %v936_v35 = vmul.f32 %v2461_v13, %v2677_v31 }
  0xa0   : > { %v836_v18 = vrot.slane %v782_v33, 2  ;;  %v838_v52 = vrot.slane %v783_v32, 2  ;;  %v716_v34 = vsel %vm422_vm1, %v714_v51, %v715_v50  ;;  %v937_v38 = vmul.f32 %v2461_v13, %v2693_v44 }
  0xa1   : > { %v2219_v47 = vpop.eup %2218  ;;  %v718_v40 = vsel %vm422_vm1, %v715_v50, %v717_v17  ;;  %v761_v10 = vadd.f32 %v716_v34, %v640_v42  ;;  %v989_v11 = vrot.slane %v935_v26, 1  ;;  %v990_v29 = vrot.slane %v936_v35, 1 }
  0xa2   : > { %v2221_v46 = vpop.eup %2220  ;;  %v1257_v55 = vadd.f32 1.0, %v2219_v47  ;;  %v762_v14 = vadd.f32 %v718_v40, %v641_v24  ;;  %v837_v15 = vsel %vm544_vm2, %v835_v41, %v836_v18  ;;  %v839_v49 = vsel %vm544_vm2, %v836_v18, %v838_v52 }
  0xa3   : > { %v3080_v21 = vadd.f32 1.0, %v2221_v46  ;;  %v899_v43 = vmul.f32 %v2459_v12, %v2674_v30  ;;  %v900_v1 = vmul.f32 %v2459_v12, %v2677_v31  ;;  %v882_v37 = vadd.f32 %v837_v15, %v761_v10 }
  0xa4   : > { %2222 = vrcp.f32 %v1257_v55  ;;  %v1312_v0 = vand.u32 2147483648, %v1257_v55  ;;  %vm1306_vm9 = vweird.f32 %v1257_v55  ;;  %v1310_v39 = vand.u32 2147483647, %v1257_v55 }
  0xa5   : > { %2224 = vrcp.f32 %v3080_v21  ;;  %v1327_v36 = vand.u32 2147483648, %v3080_v21  ;;  %vm1321_vm10 = vweird.f32 %v3080_v21  ;;  %v1325_v56 = vand.u32 2147483647, %v3080_v21 }
  0xa6   : > { %v883_v53 = vadd.f32 %v839_v49, %v762_v14  ;;  %v1313_v27 = vor.u32 1.1754944e-38, %v1312_v0  ;;  %v991_v9 = vsel %vm422_vm1, %v989_v11, %v990_v29  ;;  %v992_v45 = vrot.slane %v937_v38, 1  ;;  %v3130_v0 = vld [vmem:[%s3520_s2] ss:$0 sm:$0xff] }
  0xa7   : > { %v3091_v63 = vor.u32 1.1754944e-38, %v1327_v36  ;;  %v915_v48 = vadd.f32 %v899_v43, %v882_v37  ;;  %v1056_v61 = vmul.f32 %v3097_v23, %v2674_v30  ;;  %v1057_v62 = vmul.f32 %v3097_v23, %v2677_v31 }
  0xa8   : > { %v916_v28 = vadd.f32 %v900_v1, %v883_v53  ;;  %vm3103_vm12 = vcmp.eq.f32.partialorder %v1310_v39, 8.507059e+37  ;;  %v993_v42 = vsel %vm422_vm1, %v990_v29, %v992_v45  ;;  %v1058_v58 = vmul.f32 %v3097_v23, %v2693_v44 }
  0xa9   : > { %v351_v20 = vmul.f32 %v2439_v3, %v2674_v30  ;;  %v352_v25 = vmul.f32 %v2439_v3, %v2677_v31  ;;  %vm3114_vm13 = vcmp.eq.f32.partialorder %v1325_v56, 8.507059e+37  ;;  %v1036_v33 = vadd.f32 %v991_v9, %v915_v48 }
  0xaa   : > { %v2223_v24 = vpop.eup %2222  ;;  %v1037_v32 = vadd.f32 %v993_v42, %v916_v28  ;;  %v1110_v50 = vrot.slane %v1056_v61, 2  ;;  %v1111_v17 = vrot.slane %v1057_v62, 2  ;;  %v1113_v52 = vrot.slane %v1058_v58, 2 }
  0xab   : > { %v2225_v41 = vpop.eup %2224  ;;  %v1302_v18 = vmul.f32 %v2223_v24, %v1257_v55  ;;  %vm1307_vm14 = vweird.f32 %v2223_v24  ;;  %v389_v26 = vmul.f32 %v2441_v4, %v2674_v30  ;;  %v390_v40 = vmul.f32 %v2441_v4, %v2677_v31  ;;  %v3155_v55 = vld [vmem:[%s3521_s3] ss:$0 sm:$0xff] }
  0xac   : > { %v1317_v47 = vmul.f32 %v2225_v41, %v3080_v21  ;;  %vm1322_vm15 = vweird.f32 %v2225_v41  ;;  %v1112_v34 = vsel %vm544_vm2, %v1110_v50, %v1111_v17  ;;  %v1114_v38 = vsel %vm544_vm2, %v1111_v17, %v1113_v52  ;;  %vm3137_vm0 = vmor %vm1306_vm9, %vm1307_vm14 }
  0xad   : > { %v1303_v35 = vsub.f32 1.0, %v1302_v18  ;;  %v1157_v46 = vadd.f32 %v1112_v34, %v1036_v33  ;;  %v391_v10 = vmul.f32 %v2441_v4, %v2693_v44  ;;  %v1158_v15 = vadd.f32 %v1114_v38, %v1037_v32  ;;  %vm3148_vm3 = vmor %vm1321_vm10, %vm1322_vm15 }
  0xae   : > { %v1318_v14 = vsub.f32 1.0, %v1317_v47  ;;  %v448_v49 = vrot.slane %v389_v26, 1  ;;  %v449_v11 = vrot.slane %v390_v40, 1  ;;  %v511_v39 = vmul.f32 %v2446_v5, %v2674_v30 }
  0xaf   : > { %v1304_v29 = vmul.f32 %v2223_v24, %v1303_v35  ;;  %v1177_v43 = vmul.f32 %v3130_v0, %v1157_v46  ;;  %v451_v1 = vrot.slane %v391_v10, 1  ;;  %v1178_v37 = vmul.f32 %v3130_v0, %v1158_v15 }
  0xb0   : > { %v1319_v56 = vmul.f32 %v2225_v41, %v1318_v14  ;;  %v450_v53 = vsel %vm422_vm1, %v448_v49, %v449_v11  ;;  %v512_v9 = vmul.f32 %v2446_v5, %v2677_v31  ;;  %v513_v42 = vmul.f32 %v2446_v5, %v2693_v44 }
  0xb1   : > { %v1305_v45 = vadd.f32 %v2223_v24, %v1304_v29  ;;  %v3158_v48 = vadd.f32 %v3155_v55, %v1177_v43  ;;  %v452_v28 = vsel %vm422_vm1, %v449_v11, %v451_v1  ;;  %v489_v61 = vadd.f32 %v450_v53, %v351_v20 }
  0xb2   : > { %v1320_v31 = vadd.f32 %v2225_v41, %v1319_v56  ;;  %v3162_v62 = vadd.f32 %v3155_v55, %v1178_v37  ;;  %v490_v21 = vadd.f32 %v452_v28, %v352_v25  ;;  %v570_v32 = vrot.slane %v511_v39, 2 }
  0xb3   : > { %v1309_v58 = vsel %vm3137_vm0, %v2223_v24, %v1305_v45  ;;  %v2101_v33 = vmul.f32 -1.442695, %v3158_v48  ;;  %v571_v50 = vrot.slane %v512_v9, 2  ;;  %v573_v52 = vrot.slane %v513_v42, 2 }
  0xb4   : > { %v1314_v17 = vsel %vm3103_vm12, %v1313_v27, %v1309_v58  ;;  %v1324_v20 = vsel %vm3148_vm3, %v2225_v41, %v1320_v31  ;;  %v2102_v18 = vmul.f32 -1.442695, %v3162_v62  ;;  %v628_v41 = vmul.f32 %v2450_v6, %v2735_v59 }
  0xb5   : > { %v1329_v44 = vsel %vm3114_vm13, %v3091_v63, %v1324_v20  ;;  %v1513_v25 = vmul.f32 %v1314_v17, %v3037_v54  ;;  %2226 = vpow2.f32 %v2101_v33  ;;  %v572_v24 = vsel %vm544_vm2, %v570_v32, %v571_v50 }
  0xb6   : > { %v1514_v26 = vmul.f32 %v1329_v44, %v3044_v60  ;;  %2228 = vpow2.f32 %v2102_v18  ;;  %v574_v27 = vsel %vm544_vm2, %v571_v50, %v573_v52  ;;  %v611_v19 = vadd.f32 %v572_v24, %v489_v61  ;;  %v3578_v18 = vld [vmem:[#allocation2_spill] sm:$0xff] }
  0xb7   : > { %v612_v47 = vadd.f32 %v574_v27, %v490_v21  ;;  %v629_v34 = vmul.f32 %v2450_v6, %v2745_v2  ;;  %v666_v63 = vmul.f32 %v2452_v7, %v2735_v59  ;;  %v667_v51 = vmul.f32 %v2452_v7, %v2745_v2 }
  0xb8   : > { %v1528_v54 = vpack.c.bf16 %v1514_v26, %v1513_v25  ;;  %v668_v60 = vmul.f32 %v2452_v7, %v2749_v16  ;;  %v787_v40 = vmul.f32 %v2454_v8, %v2735_v59  ;;  %v644_v35 = vadd.f32 %v628_v41, %v611_v19 }
  0xb9   : > { %v645_v38 = vadd.f32 %v629_v34, %v612_v47  ;;  %v724_v46 = vrot.slane %v666_v63, 1  ;;  %v788_v10 = vmul.f32 %v2454_v8, %v2745_v2  ;;  %v725_v14 = vrot.slane %v667_v51, 1 }
  0xba   : > { %2112 = vmatmul.msk.bf16.gmra.mxu0 %vm1536_vm11, %v1528_v54  ;;  %v727_v15 = vrot.slane %v668_v60, 1  ;;  %v789_v49 = vmul.f32 %v2454_v8, %v2749_v16  ;;  %v845_v11 = vrot.slane %v787_v40, 2  ;;  %v903_v1 = vmul.f32 %v2459_v12, %v2826_v57 }
  0xbb   : > { %v2227_v29 = vpop.eup %2226  ;;  %v846_v43 = vrot.slane %v788_v10, 2  ;;  %v726_v36 = vsel %vm422_vm1, %v724_v46, %v725_v14  ;;  %v904_v30 = vmul.f32 %v2459_v12, %v2829_v22  ;;  %v941_v28 = vmul.f32 %v2461_v13, %v2826_v57 }
  0xbc   : > { %v2229_v59 = vpop.eup %2228  ;;  %v1261_v39 = vadd.f32 1.0, %v2227_v29  ;;  %v728_v56 = vsel %vm422_vm1, %v725_v14, %v727_v15  ;;  %v848_v2 = vrot.slane %v789_v49, 2  ;;  %v765_v53 = vadd.f32 %v726_v36, %v644_v35 }
  0xbd   : > { %v1262_v37 = vadd.f32 1.0, %v2229_v59  ;;  %v766_v9 = vadd.f32 %v728_v56, %v645_v38  ;;  %v847_v45 = vsel %vm544_vm2, %v845_v11, %v846_v43  ;;  %v942_v17 = vmul.f32 %v2461_v13, %v2829_v22 }
  0xbe   : > { %2230 = vrcp.f32 %v1261_v39  ;;  %v1372_v16 = vand.u32 2147483648, %v1261_v39  ;;  %vm1366_vm4 = vweird.f32 %v1261_v39  ;;  %v1370_v61 = vand.u32 2147483647, %v1261_v39 }
  0xbf   : > { %2232 = vrcp.f32 %v1262_v37  ;;  %v1387_v31 = vand.u32 2147483648, %v1262_v37  ;;  %vm1381_vm5 = vweird.f32 %v1262_v37  ;;  %v1385_v21 = vand.u32 2147483647, %v1262_v37 }
  0xc0   : > { %v849_v42 = vsel %vm544_vm2, %v846_v43, %v848_v2  ;;  %v886_v58 = vadd.f32 %v847_v45, %v765_v53  ;;  %v1373_v33 = vor.u32 1.1754944e-38, %v1372_v16  ;;  %v943_v52 = vmul.f32 %v2461_v13, %v3578_v18 }
  0xc1   : > { %v1388_v32 = vor.u32 1.1754944e-38, %v1387_v31  ;;  %v887_v50 = vadd.f32 %v849_v42, %v766_v9  ;;  %v999_v44 = vrot.slane %v941_v28, 1  ;;  %v1062_v25 = vmul.f32 %v3097_v23, %v2826_v57 }
  0xc2   : > { %v919_v20 = vadd.f32 %v903_v1, %v886_v58  ;;  %vm3214_vm6 = vcmp.eq.f32.partialorder %v1370_v61, 8.507059e+37  ;;  %v1000_v27 = vrot.slane %v942_v17, 1  ;;  %v1063_v19 = vmul.f32 %v3097_v23, %v2829_v22 }
  0xc3   : > { %v920_v26 = vadd.f32 %v904_v30, %v887_v50  ;;  %v1064_v47 = vmul.f32 %v3097_v23, %v3578_v18  ;;  %vm3222_vm7 = vcmp.eq.f32.partialorder %v1385_v21, 8.507059e+37  ;;  %v1002_v63 = vrot.slane %v943_v52, 1 }
  0xc4   : > { %v2231_v41 = vpop.eup %2230  ;;  %v1120_v54 = vrot.slane %v1062_v25, 2  ;;  %v355_v51 = vmul.f32 %v2439_v3, %v2826_v57  ;;  %v356_v60 = vmul.f32 %v2439_v3, %v2829_v22  ;;  %v1001_v38 = vsel %vm422_vm1, %v999_v44, %v1000_v27 }
  0xc5   : > { %v2233_v40 = vpop.eup %2232  ;;  %v1362_v35 = vmul.f32 %v2231_v41, %v1261_v39  ;;  %vm1367_vm8 = vweird.f32 %v2231_v41  ;;  %v1121_v46 = vrot.slane %v1063_v19, 2  ;;  %v1003_v14 = vsel %vm422_vm1, %v1000_v27, %v1002_v63 }
  0xc6   : > { %v1377_v10 = vmul.f32 %v2233_v40, %v1262_v37  ;;  %vm1382_vm9 = vweird.f32 %v2233_v40  ;;  %v1040_v15 = vadd.f32 %v1001_v38, %v919_v20  ;;  %v1041_v11 = vadd.f32 %v1003_v14, %v920_v26  ;;  %vm3244_vm10 = vmor %vm1366_vm4, %vm1367_vm8 }
  0xc7   : > { %v1363_v49 = vsub.f32 1.0, %v1362_v35  ;;  %v1122_v29 = vsel %vm544_vm2, %v1120_v54, %v1121_v46  ;;  %v1123_v43 = vrot.slane %v1064_v47, 2  ;;  %v395_v3 = vmul.f32 %v2441_v4, %v2826_v57  ;;  %vm3251_vm12 = vmor %vm1381_vm5, %vm1382_vm9  ;;  %v3587_v54 = vld [vmem:[#allocation3_spill] sm:$0xff]  ;;  %v3588_v35 = vld [vmem:[#allocation4_spill] sm:$0xff] }
  0xc8   : > { %v1378_v1 = vsub.f32 1.0, %v1377_v10  ;;  %v1161_v59 = vadd.f32 %v1122_v29, %v1040_v15  ;;  %v396_v36 = vmul.f32 %v2441_v4, %v2829_v22  ;;  %v397_v53 = vmul.f32 %v2441_v4, %v3578_v18  ;;  %v335_v29 = vld [vmem:[%s2448_s17 + $0xd8] sm:$0xff] }
  0xc9   : > { %v1364_v56 = vmul.f32 %v2231_v41, %v1363_v49  ;;  %v1124_v2 = vsel %vm544_vm2, %v1121_v46, %v1123_v43  ;;  %v517_v9 = vmul.f32 %v2446_v5, %v2826_v57  ;;  %v458_v61 = vrot.slane %v395_v3, 1  ;;  %v3589_v46 = vld [vmem:[#allocation5_spill] sm:$0xff] }
  0xca   : > { %v1379_v16 = vmul.f32 %v2233_v40, %v1378_v1  ;;  %v1162_v30 = vadd.f32 %v1124_v2, %v1041_v11  ;;  %v1181_v28 = vmul.f32 %v3130_v0, %v1161_v59  ;;  %v459_v4 = vrot.slane %v396_v36, 1 }
  0xcb   : > { %v1365_v31 = vadd.f32 %v2231_v41, %v1364_v56  ;;  %v461_v57 = vrot.slane %v397_v53, 1  ;;  %v518_v39 = vmul.f32 %v2446_v5, %v2829_v22  ;;  %v519_v17 = vmul.f32 %v2446_v5, %v3578_v18 }
  0xcc   : > { %v1380_v42 = vadd.f32 %v2233_v40, %v1379_v16  ;;  %v1182_v58 = vmul.f32 %v3130_v0, %v1162_v30  ;;  %v3259_v50 = vadd.f32 %v3155_v55, %v1181_v28  ;;  %v460_v20 = vsel %vm422_vm1, %v458_v61, %v459_v4 }
  0xcd   : > { %v1369_v37 = vsel %vm3244_vm10, %v2231_v41, %v1365_v31  ;;  %v462_v52 = vsel %vm422_vm1, %v459_v4, %v461_v57  ;;  %v580_v44 = vrot.slane %v517_v9, 2  ;;  %v493_v19 = vadd.f32 %v460_v20, %v355_v51  ;;  %v336_v9 = vld [vmem:[%s2448_s17 + $0xe0] sm:$0xff]  ;;  %v337_v57 = vld [vmem:[%s2448_s17 + $0xe8] sm:$0x3] }
  0xce   : > { %v1374_v22 = vsel %vm3214_vm6, %v1373_v33, %v1369_v37  ;;  %v1384_v25 = vsel %vm3251_vm12, %v2233_v40, %v1380_v42  ;;  %v3272_v26 = vadd.f32 %v3155_v55, %v1182_v58  ;;  %v2105_v27 = vmul.f32 -1.442695, %v3259_v50 }
  0xcf   : > { %v1389_v5 = vsel %vm3222_vm7, %v1388_v32, %v1384_v25  ;;  %v1517_v18 = vmul.f32 %v1374_v22, %v3158_v48  ;;  %v494_v47 = vadd.f32 %v462_v52, %v356_v60  ;;  %v581_v24 = vrot.slane %v518_v39, 2 }
  0xd0   : > { %v1518_v41 = vmul.f32 %v1389_v5, %v3162_v62  ;;  %2234 = vpow2.f32 %v2105_v27  ;;  %v2106_v33 = vmul.f32 -1.442695, %v3272_v26  ;;  %v583_v63 = vrot.slane %v519_v17, 2 }
  0xd1   : > { %v632_v40 = vmul.f32 %v2450_v6, %v3587_v54  ;;  %v633_v38 = vmul.f32 %v2450_v6, %v3588_v35  ;;  %v672_v32 = vmul.f32 %v2452_v7, %v3587_v54  ;;  %v582_v34 = vsel %vm544_vm2, %v580_v44, %v581_v24 }
  0xd2   : > { %v1530_v48 = vpack.c.bf16 %v1518_v41, %v1517_v18  ;;  %2236 = vpow2.f32 %v2106_v33  ;;  %v673_v62 = vmul.f32 %v2452_v7, %v3588_v35  ;;  %v584_v51 = vsel %vm544_vm2, %v581_v24, %v583_v63 }
  0xd3   : > { %v615_v60 = vadd.f32 %v582_v34, %v493_v19  ;;  %v674_v10 = vmul.f32 %v2452_v7, %v3589_v46  ;;  %v734_v14 = vrot.slane %v672_v32, 1  ;;  %v616_v6 = vadd.f32 %v584_v51, %v494_v47 }
  0xd4   : > { %2114 = vmatmul.msk.bf16.gmra.mxu1 %vm1536_vm11, %v1530_v48  ;;  %v735_v15 = vrot.slane %v673_v62, 1  ;;  %v793_v49 = vmul.f32 %v2454_v8, %v3587_v54  ;;  %v794_v11 = vmul.f32 %v2454_v8, %v3588_v35  ;;  %v795_v59 = vmul.f32 %v2454_v8, %v3589_v46 }
  0xd5   : > { %v648_v43 = vadd.f32 %v632_v40, %v615_v60  ;;  %v737_v1 = vrot.slane %v674_v10, 1  ;;  %v649_v7 = vadd.f32 %v633_v38, %v616_v6  ;;  %v907_v21 = vmul.f32 %v2459_v12, %v335_v29 }
  0xd6   : > { %v2235_v3 = vpop.eup %2234  ;;  %v736_v36 = vsel %vm422_vm1, %v734_v14, %v735_v15  ;;  %v855_v56 = vrot.slane %v793_v49, 2  ;;  %v856_v2 = vrot.slane %v794_v11, 2  ;;  %v858_v30 = vrot.slane %v795_v59, 2 }
  0xd7   : > { %v1265_v53 = vadd.f32 1.0, %v2235_v3  ;;  %v738_v45 = vsel %vm422_vm1, %v735_v15, %v737_v1  ;;  %v769_v16 = vadd.f32 %v736_v36, %v648_v43  ;;  %v947_v4 = vmul.f32 %v2461_v13, %v335_v29 }
  0xd8   : > { %v2237_v28 = vpop.eup %2236  ;;  %v770_v61 = vadd.f32 %v738_v45, %v649_v7  ;;  %v857_v31 = vsel %vm544_vm2, %v855_v56, %v856_v2  ;;  %v859_v39 = vsel %vm544_vm2, %v856_v2, %v858_v30  ;;  %v908_v58 = vmul.f32 %v2459_v12, %v336_v9  ;;  %v3335_v30 = vld [vmem:[%s3523_s5] ss:$0 sm:$0xff] }
  0xd9   : > { %v1266_v8 = vadd.f32 1.0, %v2237_v28  ;;  %2238 = vrcp.f32 %v1265_v53  ;;  %v890_v42 = vadd.f32 %v857_v31, %v769_v16  ;;  %v948_v17 = vmul.f32 %v2461_v13, %v336_v9  ;;  %v1574_v16 = vpop.f32.mrf.mxu0 }
  0xda   : > { %v891_v37 = vadd.f32 %v859_v39, %v770_v61  ;;  %vm1426_vm13 = vweird.f32 %v1265_v53  ;;  %v949_v52 = vmul.f32 %v2461_v13, %v337_v57  ;;  %v1009_v44 = vrot.slane %v947_v4, 1 }
  0xdb   : > { %2240 = vrcp.f32 %v1266_v8  ;;  %v923_v20 = vadd.f32 %v907_v21, %v890_v42  ;;  %v1010_v22 = vrot.slane %v948_v17, 1  ;;  %v1430_v25 = vand.u32 2147483647, %v1265_v53 }
  0xdc   : > { %v924_v27 = vadd.f32 %v908_v58, %v891_v37  ;;  %v1068_v5 = vmul.f32 %v3097_v23, %v335_v29  ;;  %v1069_v18 = vmul.f32 %v3097_v23, %v336_v9  ;;  %v1432_v47 = vand.u32 2147483648, %v1265_v53 }
  0xdd   : > { %v1011_v12 = vsel %vm422_vm1, %v1009_v44, %v1010_v22  ;;  %v1012_v41 = vrot.slane %v949_v52, 1  ;;  %v1070_v33 = vmul.f32 %v3097_v23, %v337_v57  ;;  %vm1441_vm14 = vweird.f32 %v1266_v8 }
  0xde   : > { %v1044_v63 = vadd.f32 %v1011_v12, %v923_v20  ;;  %v1130_v54 = vrot.slane %v1068_v5, 2  ;;  %v1445_v40 = vand.u32 2147483647, %v1266_v8  ;;  %v1131_v38 = vrot.slane %v1069_v18, 2 }
  0xdf   : > { %v2239_v19 = vpop.eup %2238  ;;  %v1013_v35 = vsel %vm422_vm1, %v1010_v22, %v1012_v41  ;;  %v1133_v32 = vrot.slane %v1070_v33, 2  ;;  %v1447_v51 = vand.u32 2147483648, %v1266_v8  ;;  %vm1431_vm4 = vcmp.eq.f32.partialorder %v1430_v25, 8.507059e+37 }
  0xe0   : > { %v1422_v24 = vmul.f32 %v2239_v19, %v1265_v53  ;;  %vm1427_vm15 = vweird.f32 %v2239_v19  ;;  %v1045_v62 = vadd.f32 %v1013_v35, %v924_v27  ;;  %v1132_v60 = vsel %vm544_vm2, %v1130_v54, %v1131_v38 }
  0xe1   : > { %v2241_v13 = vpop.eup %2240  ;;  %v1134_v23 = vsel %vm544_vm2, %v1131_v38, %v1133_v32  ;;  %v1165_v14 = vadd.f32 %v1132_v60, %v1044_v63  ;;  %vm1428_vm3 = vmor %vm1426_vm13, %vm1427_vm15  ;;  %v1433_v15 = vor.u32 1.1754944e-38, %v1432_v47  ;;  %vm1446_vm5 = vcmp.eq.f32.partialorder %v1445_v40, 8.507059e+37 }
  0xe2   : > { %v1423_v48 = vsub.f32 1.0, %v1422_v24  ;;  %v1437_v34 = vmul.f32 %v2241_v13, %v1266_v8  ;;  %vm1442_vm0 = vweird.f32 %v2241_v13  ;;  %v1166_v6 = vadd.f32 %v1134_v23, %v1045_v62  ;;  %v1584_v21 = vpop.f32.mrf.mxu1 }
  0xe3   : > { %v1185_v29 = vmul.f32 %v3130_v0, %v1165_v14  ;;  %vm1443_vm1 = vmor %vm1441_vm14, %vm1442_vm0  ;;  %v1448_v1 = vor.u32 1.1754944e-38, %v1447_v51  ;;  %v1622_v8 = vmul.f32 %v3335_v30, %v1584_v21 }
  0xe4   : > { %v1424_v46 = vmul.f32 %v2239_v19, %v1423_v48  ;;  %v1438_v10 = vsub.f32 1.0, %v1437_v34  ;;  %v1186_v43 = vmul.f32 %v3130_v0, %v1166_v6 }
  0xe5   : > { %v3324_v7 = vadd.f32 %v3155_v55, %v1185_v29 }
  0xe6   : > { %v1425_v49 = vadd.f32 %v2239_v19, %v1424_v46  ;;  %v1439_v11 = vmul.f32 %v2241_v13, %v1438_v10  ;;  %v3327_v36 = vadd.f32 %v3155_v55, %v1186_v43  ;;  %v3340_v55 = vld [vmem:[%s3524_s6] ss:$0 sm:$0xff] }
  0xe7   : > { %v2109_v9 = vmul.f32 -1.442695, %v3324_v7  ;;  %v3351_v39 = vadd.f32 %v3340_v55, %v1622_v8 }
  0xe8   : > { %v1429_v59 = vsel %vm1428_vm3, %v2239_v19, %v1425_v49  ;;  %v1440_v3 = vadd.f32 %v2241_v13, %v1439_v11  ;;  %v2110_v0 = vmul.f32 -1.442695, %v3327_v36 }
  0xe9   : > { %v1434_v56 = vsel %vm1431_vm4, %v1433_v15, %v1429_v59  ;;  %2242 = vpow2.f32 %v2109_v9  ;;  %v2123_v17 = vmul.f32 -1.442695, %v3351_v39 }
  0xea   : > { %v1444_v2 = vsel %vm1443_vm1, %v2241_v13, %v1440_v3  ;;  %v1521_v53 = vmul.f32 %v1434_v56, %v3259_v50  ;;  %2244 = vpow2.f32 %v2110_v0  ;;  %v1618_v50 = vmul.f32 %v3335_v30, %v1574_v16 }
  0xeb   : > { %v1449_v45 = vsel %vm1446_vm5, %v1448_v1, %v1444_v2  ;;  %vm1974_vm5 = vcmask 64512  }
  0xec   : > { %v1522_v28 = vmul.f32 %v1449_v45, %v3272_v26  ;;  %v3345_v31 = vadd.f32 %v3340_v55, %v1618_v50 }
  0xee   : > { %v1532_v61 = vpack.c.bf16 %v1522_v28, %v1521_v53  ;;  %v2119_v4 = vmul.f32 -1.442695, %v3345_v31 }
  0xef   : > { %v2243_v57 = vpop.eup %2242 }
  0xf0   : > { %2116 = vmatmul.msk.bf16.gmra.mxu2 %vm1536_vm11, %v1532_v61  ;;  %v2245_v26 = vpop.eup %2244  ;;  %v1269_v42 = vadd.f32 1.0, %v2243_v57  ;;  %2246 = vpow2.f32 %v2119_v4 }
  0xf1   : > { %v1270_v58 = vadd.f32 1.0, %v2245_v26 }
  0xf2   : > { %2248 = vrcp.f32 %v1269_v42  ;;  %vm1486_vm2 = vweird.f32 %v1269_v42  ;;  %v1490_v27 = vand.u32 2147483647, %v1269_v42  ;;  %v1492_v5 = vand.u32 2147483648, %v1269_v42 }
  0xf3   : > { %2250 = vrcp.f32 %v1270_v58  ;;  %v1507_v47 = vand.u32 2147483648, %v1270_v58  ;;  %vm1501_vm7 = vweird.f32 %v1270_v58  ;;  %v1505_v33 = vand.u32 2147483647, %v1270_v58 }
  0xf4   : > { %2252 = vpow2.f32 %v2123_v17  ;;  %v1493_v63 = vor.u32 1.1754944e-38, %v1492_v5  ;;  %vm1491_vm10 = vcmp.eq.f32.partialorder %v1490_v27, 8.507059e+37 }
  0xf5   : > { %v1508_v35 = vor.u32 1.1754944e-38, %v1507_v47  ;;  %vm1506_vm13 = vcmp.eq.f32.partialorder %v1505_v33, 8.507059e+37  ;;  %v1586_v47 = vpop.f32.mrf.mxu1 }
  0xf6   : > { %v2247_v37 = vpop.eup %2246 }
  0xf7   : > { %v1702_v20 = vadd.f32 1.0, %v2247_v37 }
  0xf8   : > { %v2249_v52 = vpop.eup %2248 }
  0xf9   : > { %v2251_v44 = vpop.eup %2250  ;;  %v1482_v22 = vmul.f32 %v2249_v52, %v1269_v42  ;;  %2254 = vrcp.f32 %v1702_v20  ;;  %vm1487_vm6 = vweird.f32 %v2249_v52  ;;  %v1727_v60 = vand.u32 2147483647, %v1702_v20 }
  0xfa   : > { %v2253_v25 = vpop.eup %2252  ;;  %v1497_v18 = vmul.f32 %v2251_v44, %v1270_v58  ;;  %vm1502_vm8 = vweird.f32 %v2251_v44  ;;  %vm1488_vm9 = vmor %vm1486_vm2, %vm1487_vm6  ;;  %vm1723_vm14 = vweird.f32 %v1702_v20  ;;  %v1729_v14 = vand.u32 2147483648, %v1702_v20 }
  0xfb   : > { %v1483_v19 = vsub.f32 1.0, %v1482_v22  ;;  %v3359_v12 = vadd.f32 1.0, %v2253_v25  ;;  %vm1503_vm12 = vmor %vm1501_vm7, %vm1502_vm8  ;;  %vm1728_vm0 = vcmp.eq.f32.partialorder %v1727_v60, 8.507059e+37 }
  0xfc   : > { %v1498_v41 = vsub.f32 1.0, %v1497_v18  ;;  %v1730_v3 = vor.u32 1.1754944e-38, %v1729_v14 }
  0xfd   : > { %v1484_v24 = vmul.f32 %v2249_v52, %v1483_v19  ;;  %2256 = vrcp.f32 %v3359_v12  ;;  %vm1783_vm4 = vweird.f32 %v3359_v12  ;;  %v1787_v53 = vand.u32 2147483647, %v3359_v12 }
  0xfe   : > { %v1499_v54 = vmul.f32 %v2251_v44, %v1498_v41  ;;  %v1623_v41 = vmul.f32 %v3335_v30, %v1586_v47 }
  0xff   : > { %v2255_v13 = vpop.eup %2254  ;;  %v1485_v40 = vadd.f32 %v2249_v52, %v1484_v24 }
 0x100   : > { %v1500_v38 = vadd.f32 %v2251_v44, %v1499_v54  ;;  %v1719_v32 = vmul.f32 %v2255_v13, %v1702_v20  ;;  %vm1724_vm15 = vweird.f32 %v2255_v13  ;;  %v3400_v24 = vadd.f32 %v3340_v55, %v1623_v41 }
 0x101   : > { %v1489_v48 = vsel %vm1488_vm9, %v2249_v52, %v1485_v40  ;;  %vm1725_vm3 = vmor %vm1723_vm14, %vm1724_vm15 }
 0x102   : > { %v1494_v34 = vsel %vm1491_vm10, %v1493_v63, %v1489_v48  ;;  %v1504_v62 = vsel %vm1503_vm12, %v2251_v44, %v1500_v38  ;;  %v1720_v51 = vsub.f32 1.0, %v1719_v32  ;;  %v1576_v44 = vpop.f32.mrf.mxu0 }
 0x103   : > { %v2257_v23 = vpop.eup %2256  ;;  %v1509_v46 = vsel %vm1506_vm13, %v1508_v35, %v1504_v62  ;;  %v1525_v10 = vmul.f32 %v1494_v34, %v3324_v7  ;;  %v1789_v7 = vand.u32 2147483648, %v3359_v12  ;;  %v1619_v25 = vmul.f32 %v3335_v30, %v1576_v44 }
 0x104   : > { %v1526_v15 = vmul.f32 %v1509_v46, %v3327_v36  ;;  %v1721_v49 = vmul.f32 %v2255_v13, %v1720_v51  ;;  %v1779_v11 = vmul.f32 %v2257_v23, %v3359_v12  ;;  %vm1784_vm1 = vweird.f32 %v2257_v23 }
 0x105   : > { %vm1785_vm2 = vmor %vm1783_vm4, %vm1784_vm1  ;;  %v1790_v28 = vor.u32 1.1754944e-38, %v1789_v7  ;;  %v3393_v19 = vadd.f32 %v3340_v55, %v1619_v25 }
 0x106   : > { %v1594_v6 = vpop.f32.mrf.mxu2  ;;  %v1534_v43 = vpack.c.bf16 %v1526_v15, %v1525_v10  ;;  %v1722_v1 = vadd.f32 %v2255_v13, %v1721_v49  ;;  %v1780_v59 = vsub.f32 1.0, %v1779_v11 }
 0x107   : > { %v1626_v29 = vmul.f32 %v3335_v30, %v1594_v6  ;;  %v2120_v33 = vmul.f32 -1.442695, %v3393_v19 }
 0x108   : > { %2118 = vmatmul.msk.bf16.gmra.mxu3 %vm1536_vm11, %v1534_v43  ;;  %v1726_v36 = vsel %vm1725_vm3, %v2255_v13, %v1722_v1  ;;  %v1781_v2 = vmul.f32 %v2257_v23, %v1780_v59  ;;  %vm1788_vm11 = vcmp.eq.f32.partialorder %v1787_v53, 8.507059e+37  ;;  %v2124_v13 = vmul.f32 -1.442695, %v3400_v24 }
 0x109   : > { %v1646_v56 = vadd.f32 %v3340_v55, %v1626_v29  ;;  %v1731_v9 = vsel %vm1728_vm0, %v1730_v3, %v1726_v36 }
 0x10a   : > { %v1958_v45 = vmul.f32 %v1731_v9, %v3345_v31  ;;  %v1782_v16 = vadd.f32 %v2257_v23, %v1781_v2 }
 0x10b   : > { %v2127_v0 = vmul.f32 -1.442695, %v1646_v56 }
 0x10c   : > { %1975 = vst.msk [vmem:[%s3378_s8] sm:$0xff] %vm1974_vm5, %v1958_v45  ;;  %v1786_v50 = vsel %vm1785_vm2, %v2257_v23, %v1782_v16 }
 0x10d   : > { %2258 = vpow2.f32 %v2127_v0  ;;  %v1791_v61 = vsel %vm1788_vm11, %v1790_v28, %v1786_v50 }
 0x10e   : > { %v1962_v21 = vmul.f32 %v1791_v61, %v3351_v39  ;;  %v1596_v63 = vpop.f32.mrf.mxu2 }
 0x10f   : > { %v1627_v54 = vmul.f32 %v3335_v30, %v1596_v63 }
 0x110   : > { %1979 = vst.msk [vmem:[%s3378_s8 + $0x20] sm:$0xff] %vm1974_vm5, %v1962_v21 }
 0x111   : > { %v3405_v40 = vadd.f32 %v3340_v55, %v1627_v54 }
 0x113   : > { %v2259_v8 = vpop.eup %2258  ;;  %v2128_v48 = vmul.f32 -1.442695, %v3405_v40 }
 0x114   : > { %v1710_v4 = vadd.f32 1.0, %v2259_v8 }
 0x116   : > { %2260 = vrcp.f32 %v1710_v4  ;;  %v1849_v31 = vand.u32 2147483648, %v1710_v4  ;;  %v1847_v37 = vand.u32 2147483647, %v1710_v4  ;;  %vm1843_vm7 = vweird.f32 %v1710_v4 }
 0x118   : > { %v1850_v22 = vor.u32 1.1754944e-38, %v1849_v31  ;;  %vm1848_vm9 = vcmp.eq.f32.partialorder %v1847_v37, 8.507059e+37 }
 0x11c   : > { %v2261_v57 = vpop.eup %2260 }
 0x11d   : > { %v1839_v26 = vmul.f32 %v2261_v57, %v1710_v4  ;;  %vm1844_vm6 = vweird.f32 %v2261_v57 }
 0x11e   : > { %vm1845_vm8 = vmor %vm1843_vm7, %vm1844_vm6 }
 0x11f   : > { %v1840_v42 = vsub.f32 1.0, %v1839_v26 }
 0x121   : > { %v1604_v58 = vpop.f32.mrf.mxu3  ;;  %v1841_v17 = vmul.f32 %v2261_v57, %v1840_v42 }
 0x122   : > { %v1630_v20 = vmul.f32 %v3335_v30, %v1604_v58 }
 0x123   : > { %v1842_v52 = vadd.f32 %v2261_v57, %v1841_v17 }
 0x124   : > { %v3388_v39 = vadd.f32 %v3340_v55, %v1630_v20 }
 0x125   : > { %v1846_v27 = vsel %vm1845_vm8, %v2261_v57, %v1842_v52 }
 0x126   : > { %v2131_v5 = vmul.f32 -1.442695, %v3388_v39  ;;  %v1851_v18 = vsel %vm1848_vm9, %v1850_v22, %v1846_v27 }
 0x127   : > { %v1966_v12 = vmul.f32 %v1851_v18, %v1646_v56 }
 0x128   : > { %2262 = vpow2.f32 %v2131_v5 }
 0x129   : > { %1983 = vst.msk [vmem:[%s3378_s8 + $0x40] sm:$0xff] %vm1974_vm5, %v1966_v12  ;;  %2264 = vpow2.f32 %v2120_v33  ;;  %v1606_v38 = vpop.f32.mrf.mxu3 }
 0x12a   : > { %2266 = vpow2.f32 %v2124_v13  ;;  %v1631_v34 = vmul.f32 %v3335_v30, %v1606_v38 }
 0x12c   : > { %v3410_v60 = vadd.f32 %v3340_v55, %v1631_v34 }
 0x12e   : > { %v2263_v35 = vpop.eup %2262  ;;  %v2132_v10 = vmul.f32 -1.442695, %v3410_v60 }
 0x12f   : > { %v1714_v32 = vadd.f32 1.0, %v2263_v35  ;;  %v2265_v62 = vpop.eup %2264 }
 0x130   : > { %v1703_v51 = vadd.f32 1.0, %v2265_v62  ;;  %v2267_v23 = vpop.eup %2266 }
 0x131   : > { %2268 = vrcp.f32 %v1714_v32  ;;  %v1707_v46 = vadd.f32 1.0, %v2267_v23  ;;  %v1907_v29 = vand.u32 2147483647, %v1714_v32  ;;  %v1909_v43 = vand.u32 2147483648, %v1714_v32 }
 0x132   : > { %2270 = vpow2.f32 %v2128_v48  ;;  %v1744_v2 = vand.u32 2147483648, %v1703_v51  ;;  %vm1903_vm12 = vweird.f32 %v1714_v32  ;;  %vm1738_vm14 = vweird.f32 %v1703_v51 }
 0x133   : > { %2272 = vrcp.f32 %v1703_v51  ;;  %vm3421_vm13 = vcmp.eq.f32.partialorder %v1907_v29, 8.507059e+37  ;;  %v1910_v45 = vor.u32 1.1754944e-38, %v1909_v43  ;;  %v1742_v61 = vand.u32 2147483647, %v1703_v51 }
 0x134   : > { %2274 = vrcp.f32 %v1707_v46  ;;  %v1745_v26 = vor.u32 1.1754944e-38, %v1744_v2  ;;  %v1802_v31 = vand.u32 2147483647, %v1707_v46  ;;  %v1804_v20 = vand.u32 2147483648, %v1707_v46 }
 0x135   : > { %2276 = vpow2.f32 %v2132_v10  ;;  %vm1743_vm1 = vcmp.eq.f32.partialorder %v1742_v61, 8.507059e+37  ;;  %vm1798_vm2 = vweird.f32 %v1707_v46 }
 0x136   : > { %vm1803_vm11 = vcmp.eq.f32.partialorder %v1802_v31, 8.507059e+37 }
 0x137   : > { %v2269_v14 = vpop.eup %2268  ;;  %v1579_v6 = vpop.f32.mrf.mxu0 }
 0x138   : > { %v2271_v15 = vpop.eup %2270  ;;  %v1899_v49 = vmul.f32 %v2269_v14, %v1714_v32  ;;  %v1620_v11 = vmul.f32 %v3335_v30, %v1579_v6  ;;  %vm1904_vm10 = vweird.f32 %v2269_v14 }
 0x139   : > { %v3414_v1 = vadd.f32 1.0, %v2271_v15  ;;  %v2273_v59 = vpop.eup %2272  ;;  %vm1905_vm15 = vmor %vm1903_vm12, %vm1904_vm10 }
 0x13a   : > { %v1900_v3 = vsub.f32 1.0, %v1899_v49  ;;  %v3417_v7 = vadd.f32 %v3340_v55, %v1620_v11  ;;  %v1734_v56 = vmul.f32 %v2273_v59, %v1703_v51  ;;  %v2275_v9 = vpop.eup %2274  ;;  %vm1739_vm0 = vweird.f32 %v2273_v59 }
 0x13b   : > { %2278 = vrcp.f32 %v3414_v1  ;;  %v2277_v28 = vpop.eup %2276  ;;  %v1794_v21 = vmul.f32 %v2275_v9, %v1707_v46  ;;  %vm1740_vm3 = vmor %vm1738_vm14, %vm1739_vm0  ;;  %vm1799_vm4 = vweird.f32 %v2275_v9  ;;  %v1862_v41 = vand.u32 2147483647, %v3414_v1 }
 0x13c   : > { %v1901_v36 = vmul.f32 %v2269_v14, %v1900_v3  ;;  %v2121_v53 = vmul.f32 -1.442695, %v3417_v7  ;;  %v1735_v16 = vsub.f32 1.0, %v1734_v56  ;;  %v1715_v4 = vadd.f32 1.0, %v2277_v28  ;;  %vm1800_vm6 = vmor %vm1798_vm2, %vm1799_vm4 }
 0x13d   : > { %v1795_v42 = vsub.f32 1.0, %v1794_v21  ;;  %v1864_v33 = vand.u32 2147483648, %v3414_v1  ;;  %vm1858_vm8 = vweird.f32 %v3414_v1  ;;  %vm1863_vm10 = vcmp.eq.f32.partialorder %v1862_v41, 8.507059e+37 }
 0x13e   : > { %v1902_v50 = vadd.f32 %v2269_v14, %v1901_v36  ;;  %v1736_v8 = vmul.f32 %v2273_v59, %v1735_v16  ;;  %2280 = vpow2.f32 %v2121_v53  ;;  %v1924_v46 = vand.u32 2147483648, %v1715_v4 }
 0x13f   : > { %2282 = vrcp.f32 %v1715_v4  ;;  %v1796_v44 = vmul.f32 %v2275_v9, %v1795_v42  ;;  %v1865_v34 = vor.u32 1.1754944e-38, %v1864_v33 }
 0x140   : > { %v1906_v57 = vsel %vm1905_vm15, %v2269_v14, %v1902_v50  ;;  %v1737_v37 = vadd.f32 %v2273_v59, %v1736_v8  ;;  %v1925_v49 = vor.u32 1.1754944e-38, %v1924_v46 }
 0x141   : > { %v2279_v58 = vpop.eup %2278  ;;  %v1911_v17 = vsel %vm3421_vm13, %v1910_v45, %v1906_v57  ;;  %v1797_v5 = vadd.f32 %v2275_v9, %v1796_v44  ;;  %vm1918_vm13 = vweird.f32 %v1715_v4 }
 0x142   : > { %v1970_v52 = vmul.f32 %v1911_v17, %v3388_v39  ;;  %v1854_v22 = vmul.f32 %v2279_v58, %v3414_v1  ;;  %v1741_v25 = vsel %vm1740_vm3, %v2273_v59, %v1737_v37  ;;  %v1805_v39 = vor.u32 1.1754944e-38, %v1804_v20 }
 0x143   : > { %v1746_v27 = vsel %vm1743_vm1, %v1745_v26, %v1741_v25  ;;  %v1801_v63 = vsel %vm1800_vm6, %v2275_v9, %v1797_v5  ;;  %vm1859_vm7 = vweird.f32 %v2279_v58 }
 0x144   : > { %1987 = vst.msk [vmem:[%s3378_s8 + $0x60] sm:$0xff] %vm1974_vm5, %v1970_v52  ;;  %v1855_v18 = vsub.f32 1.0, %v1854_v22  ;;  %v2281_v47 = vpop.eup %2280  ;;  %v1959_v12 = vmul.f32 %v1746_v27, %v3393_v19  ;;  %v1806_v38 = vsel %vm1803_vm11, %v1805_v39, %v1801_v63  ;;  %vm1860_vm9 = vmor %vm1858_vm8, %vm1859_vm7 }
 0x145   : > { %v1704_v13 = vadd.f32 1.0, %v2281_v47  ;;  %v2283_v35 = vpop.eup %2282  ;;  %v1963_v32 = vmul.f32 %v1806_v38, %v3400_v24  ;;  %v1922_v24 = vand.u32 2147483647, %v1715_v4 }
 0x146   : > { %v1856_v54 = vmul.f32 %v2279_v58, %v1855_v18  ;;  %1976 = vst.msk [vmem:[%s3378_s8 + $0x8] sm:$0xff] %vm1974_vm5, %v1959_v12  ;;  %v1914_v19 = vmul.f32 %v2283_v35, %v1715_v4  ;;  %vm1919_vm12 = vweird.f32 %v2283_v35 }
 0x147   : > { %2284 = vrcp.f32 %v1704_v13  ;;  %1980 = vst.msk [vmem:[%s3378_s8 + $0x28] sm:$0xff] %vm1974_vm5, %v1963_v32  ;;  %vm1920_vm14 = vmor %vm1918_vm13, %vm1919_vm12  ;;  %vm1923_vm15 = vcmp.eq.f32.partialorder %v1922_v24, 8.507059e+37  ;;  %vm1753_vm0 = vweird.f32 %v1704_v13  ;;  %v1759_v56 = vand.u32 2147483648, %v1704_v13 }
 0x148   : > { %v1857_v48 = vadd.f32 %v2279_v58, %v1856_v54  ;;  %v1915_v51 = vsub.f32 1.0, %v1914_v19  ;;  %v1757_v2 = vand.u32 2147483647, %v1704_v13 }
 0x149   : > { %v1760_v45 = vor.u32 1.1754944e-38, %v1759_v56 }
 0x14a   : > { %v1861_v62 = vsel %vm1860_vm9, %v2279_v58, %v1857_v48  ;;  %v1916_v14 = vmul.f32 %v2283_v35, %v1915_v51  ;;  %vm1758_vm1 = vcmp.eq.f32.partialorder %v1757_v2, 8.507059e+37 }
 0x14b   : > { %v1866_v23 = vsel %vm1863_vm10, %v1865_v34, %v1861_v62 }
 0x14c   : > { %v1967_v10 = vmul.f32 %v1866_v23, %v3405_v40  ;;  %v1917_v6 = vadd.f32 %v2283_v35, %v1916_v14 }
 0x14d   : > { %v2285_v15 = vpop.eup %2284 }
 0x14e   : > { %1984 = vst.msk [vmem:[%s3378_s8 + $0x48] sm:$0xff] %vm1974_vm5, %v1967_v10  ;;  %v1921_v11 = vsel %vm1920_vm14, %v2283_v35, %v1917_v6  ;;  %v1749_v29 = vmul.f32 %v2285_v15, %v1704_v13  ;;  %vm1754_vm3 = vweird.f32 %v2285_v15 }
 0x14f   : > { %v1926_v43 = vsel %vm1923_vm15, %v1925_v49, %v1921_v11  ;;  %vm1755_vm4 = vmor %vm1753_vm0, %vm1754_vm3 }
 0x150   : > { %v1971_v59 = vmul.f32 %v1926_v43, %v3410_v60  ;;  %v1750_v3 = vsub.f32 1.0, %v1749_v29 }
 0x151   : > { %v1589_v1 = vpop.f32.mrf.mxu1 }
 0x152   : > { %v1624_v40 = vmul.f32 %v3335_v30, %v1589_v1  ;;  %1988 = vst.msk [vmem:[%s3378_s8 + $0x68] sm:$0xff] %vm1974_vm5, %v1971_v59  ;;  %v1751_v36 = vmul.f32 %v2285_v15, %v1750_v3 }
 0x154   : > { %v1644_v53 = vadd.f32 %v3340_v55, %v1624_v40  ;;  %v1752_v9 = vadd.f32 %v2285_v15, %v1751_v36 }
 0x156   : > { %v2125_v0 = vmul.f32 -1.442695, %v1644_v53  ;;  %v1756_v16 = vsel %vm1755_vm4, %v2285_v15, %v1752_v9 }
 0x157   : > { %v1761_v60 = vsel %vm1758_vm1, %v1760_v45, %v1756_v16 }
 0x158   : > { %2286 = vpow2.f32 %v2125_v0  ;;  %v1960_v28 = vmul.f32 %v1761_v60, %v3417_v7  ;;  %v1581_v7 = vpop.f32.mrf.mxu0 }
 0x159   : > { %v1591_v37 = vpop.f32.mrf.mxu1  ;;  %v1621_v52 = vmul.f32 %v3335_v30, %v1581_v7 }
 0x15a   : > { %1977 = vst.msk [vmem:[%s3378_s8 + $0x10] sm:$0xff] %vm1974_vm5, %v1960_v28  ;;  %v1625_v44 = vmul.f32 %v3335_v30, %v1591_v37 }
 0x15b   : > { %v3455_v27 = vadd.f32 %v3340_v55, %v1621_v52 }
 0x15c   : > { %v3458_v5 = vadd.f32 %v3340_v55, %v1625_v44 }
 0x15d   : > { %v2122_v47 = vmul.f32 -1.442695, %v3455_v27 }
 0x15e   : > { %v2287_v50 = vpop.eup %2286  ;;  %v2126_v12 = vmul.f32 -1.442695, %v3458_v5 }
 0x15f   : > { %v1708_v61 = vadd.f32 1.0, %v2287_v50 }
 0x161   : > { %2288 = vrcp.f32 %v1708_v61  ;;  %v1819_v57 = vand.u32 2147483648, %v1708_v61  ;;  %vm1813_vm2 = vweird.f32 %v1708_v61  ;;  %v1817_v42 = vand.u32 2147483647, %v1708_v61 }
 0x162   : > { %2290 = vpow2.f32 %v2122_v47 }
 0x163   : > { %v1820_v58 = vor.u32 1.1754944e-38, %v1819_v57  ;;  %vm1818_vm7 = vcmp.eq.f32.partialorder %v1817_v42, 8.507059e+37  ;;  %2292 = vpow2.f32 %v2126_v12 }
 0x167   : > { %v2289_v21 = vpop.eup %2288 }
 0x168   : > { %v1809_v8 = vmul.f32 %v2289_v21, %v1708_v61  ;;  %vm1814_vm11 = vweird.f32 %v2289_v21  ;;  %v2291_v54 = vpop.eup %2290 }
 0x169   : > { %vm1815_vm6 = vmor %vm1813_vm2, %vm1814_vm11  ;;  %v2293_v13 = vpop.eup %2292  ;;  %v1705_v35 = vadd.f32 1.0, %v2291_v54 }
 0x16a   : > { %v1810_v4 = vsub.f32 1.0, %v1809_v8  ;;  %v1709_v32 = vadd.f32 1.0, %v2293_v13 }
 0x16b   : > { %v1772_v46 = vand.u32 2147483647, %v1705_v35  ;;  %vm1768_vm8 = vweird.f32 %v1705_v35  ;;  %v1774_v6 = vand.u32 2147483648, %v1705_v35 }
 0x16c   : > { %v1811_v26 = vmul.f32 %v2289_v21, %v1810_v4  ;;  %vm1828_vm9 = vweird.f32 %v1709_v32  ;;  %v1832_v29 = vand.u32 2147483647, %v1709_v32  ;;  %v1834_v1 = vand.u32 2147483648, %v1709_v32 }
 0x16d   : > { %vm3474_vm12 = vcmp.eq.f32.partialorder %v1772_v46, 8.507059e+37 }
 0x16e   : > { %v1812_v31 = vadd.f32 %v2289_v21, %v1811_v26  ;;  %v1835_v50 = vor.u32 1.1754944e-38, %v1834_v1  ;;  %vm1833_vm4 = vcmp.eq.f32.partialorder %v1832_v29, 8.507059e+37 }
 0x170   : > { %v1816_v17 = vsel %vm1815_vm6, %v2289_v21, %v1812_v31 }
 0x171   : > { %v1821_v20 = vsel %vm1818_vm7, %v1820_v58, %v1816_v17 }
 0x172   : > { %v1964_v22 = vmul.f32 %v1821_v20, %v1644_v53  ;;  %v1775_v53 = vor.u32 1.1754944e-38, %v1774_v6 }
 0x173   : > { %v1599_v25 = vpop.f32.mrf.mxu2 }
 0x174   : > { %1981 = vst.msk [vmem:[%s3378_s8 + $0x30] sm:$0xff] %vm1974_vm5, %v1964_v22  ;;  %v1628_v18 = vmul.f32 %v3335_v30, %v1599_v25 }
 0x176   : > { %v3466_v39 = vadd.f32 %v3340_v55, %v1628_v18 }
 0x178   : > { %v2129_v41 = vmul.f32 -1.442695, %v3466_v39 }
 0x17a   : > { %2294 = vpow2.f32 %v2129_v41 }
 0x17b   : > { %v1601_v33 = vpop.f32.mrf.mxu2  ;;  %2296 = vrcp.f32 %v1705_v35 }
 0x17c   : > { %v1629_v63 = vmul.f32 %v3335_v30, %v1601_v33  ;;  %2298 = vrcp.f32 %v1709_v32 }
 0x17e   : > { %v3471_v38 = vadd.f32 %v3340_v55, %v1629_v63 }
 0x180   : > { %v2295_v48 = vpop.eup %2294  ;;  %v2130_v34 = vmul.f32 -1.442695, %v3471_v38 }
 0x181   : > { %v1712_v19 = vadd.f32 1.0, %v2295_v48  ;;  %v2297_v62 = vpop.eup %2296 }
 0x182   : > { %v2299_v51 = vpop.eup %2298  ;;  %v1764_v23 = vmul.f32 %v2297_v62, %v1705_v35  ;;  %vm1769_vm10 = vweird.f32 %v2297_v62 }
 0x183   : > { %2300 = vrcp.f32 %v1712_v19  ;;  %v1824_v10 = vmul.f32 %v2299_v51, %v1709_v32  ;;  %vm1829_vm13 = vweird.f32 %v2299_v51  ;;  %v1879_v36 = vand.u32 2147483648, %v1712_v19  ;;  %vm1770_vm15 = vmor %vm1768_vm8, %vm1769_vm10 }
 0x184   : > { %2302 = vpow2.f32 %v2130_v34  ;;  %v1765_v24 = vsub.f32 1.0, %v1764_v23  ;;  %v1877_v0 = vand.u32 2147483647, %v1712_v19  ;;  %vm1873_vm0 = vweird.f32 %v1712_v19  ;;  %vm1830_vm3 = vmor %vm1828_vm9, %vm1829_vm13 }
 0x185   : > { %v1825_v11 = vsub.f32 1.0, %v1824_v10  ;;  %v1880_v4 = vor.u32 1.1754944e-38, %v1879_v36 }
 0x186   : > { %v1766_v43 = vmul.f32 %v2297_v62, %v1765_v24  ;;  %vm1878_vm2 = vcmp.eq.f32.partialorder %v1877_v0, 8.507059e+37 }
 0x187   : > { %v1826_v56 = vmul.f32 %v2299_v51, %v1825_v11 }
 0x188   : > { %v1767_v2 = vadd.f32 %v2297_v62, %v1766_v43 }
 0x189   : > { %v2301_v14 = vpop.eup %2300  ;;  %v1827_v16 = vadd.f32 %v2299_v51, %v1826_v56 }
 0x18a   : > { %v2303_v15 = vpop.eup %2302  ;;  %v1869_v49 = vmul.f32 %v2301_v14, %v1712_v19  ;;  %vm1874_vm14 = vweird.f32 %v2301_v14  ;;  %v1771_v28 = vsel %vm1770_vm15, %v2297_v62, %v1767_v2 }
 0x18b   : > { %v1713_v59 = vadd.f32 1.0, %v2303_v15  ;;  %v1609_v45 = vpop.f32.mrf.mxu3  ;;  %v1776_v21 = vsel %vm3474_vm12, %v1775_v53, %v1771_v28  ;;  %v1831_v8 = vsel %vm1830_vm3, %v2299_v51, %v1827_v16  ;;  %vm1875_vm1 = vmor %vm1873_vm0, %vm1874_vm14 }
 0x18c   : > { %v1870_v3 = vsub.f32 1.0, %v1869_v49  ;;  %v1632_v60 = vmul.f32 %v3335_v30, %v1609_v45  ;;  %v1961_v26 = vmul.f32 %v1776_v21, %v3455_v27  ;;  %v1836_v42 = vsel %vm1833_vm4, %v1835_v50, %v1831_v8 }
 0x18d   : > { %2304 = vrcp.f32 %v1713_v59  ;;  %v1965_v58 = vmul.f32 %v1836_v42, %v3458_v5  ;;  %v1894_v25 = vand.u32 2147483648, %v1713_v59  ;;  %v1892_v5 = vand.u32 2147483647, %v1713_v59 }
 0x18e   : > { %v1871_v9 = vmul.f32 %v2301_v14, %v1870_v3  ;;  %v1652_v57 = vadd.f32 %v3340_v55, %v1632_v60  ;;  %1978 = vst.msk [vmem:[%s3378_s8 + $0x18] sm:$0xff] %vm1974_vm5, %v1961_v26  ;;  %vm1888_vm6 = vweird.f32 %v1713_v59 }
 0x18f   : > { %1982 = vst.msk [vmem:[%s3378_s8 + $0x38] sm:$0xff] %vm1974_vm5, %v1965_v58  ;;  %v1895_v41 = vor.u32 1.1754944e-38, %v1894_v25  ;;  %vm1893_vm8 = vcmp.eq.f32.partialorder %v1892_v5, 8.507059e+37 }
 0x190   : > { %v1872_v61 = vadd.f32 %v2301_v14, %v1871_v9  ;;  %v2133_v37 = vmul.f32 -1.442695, %v1652_v57 }
 0x192   : > { %v1876_v31 = vsel %vm1875_vm1, %v2301_v14, %v1872_v61  ;;  %2306 = vpow2.f32 %v2133_v37 }
 0x193   : > { %v2305_v17 = vpop.eup %2304  ;;  %v1881_v7 = vsel %vm1878_vm2, %v1880_v4, %v1876_v31  ;;  %v1611_v22 = vpop.f32.mrf.mxu3 }
 0x194   : > { %v1968_v20 = vmul.f32 %v1881_v7, %v3466_v39  ;;  %v1884_v52 = vmul.f32 %v2305_v17, %v1713_v59  ;;  %v1633_v27 = vmul.f32 %v3335_v30, %v1611_v22  ;;  %vm1889_vm11 = vweird.f32 %v2305_v17 }
 0x195   : > { %vm1890_vm7 = vmor %vm1888_vm6, %vm1889_vm11 }
 0x196   : > { %1985 = vst.msk [vmem:[%s3378_s8 + $0x50] sm:$0xff] %vm1974_vm5, %v1968_v20  ;;  %v1885_v44 = vsub.f32 1.0, %v1884_v52  ;;  %v1653_v47 = vadd.f32 %v3340_v55, %v1633_v27 }
 0x198   : > { %v1886_v18 = vmul.f32 %v2305_v17, %v1885_v44  ;;  %v2307_v39 = vpop.eup %2306  ;;  %v2134_v33 = vmul.f32 -1.442695, %v1653_v47 }
 0x199   : > { %v1716_v63 = vadd.f32 1.0, %v2307_v39 }
 0x19a   : > { %v1887_v12 = vadd.f32 %v2305_v17, %v1886_v18  ;;  %2308 = vpow2.f32 %v2134_v33 }
 0x19b   : > { %2310 = vrcp.f32 %v1716_v63  ;;  %v1939_v34 = vand.u32 2147483648, %v1716_v63  ;;  %v1937_v51 = vand.u32 2147483647, %v1716_v63  ;;  %vm1933_vm10 = vweird.f32 %v1716_v63 }
 0x19c   : > { %v1891_v54 = vsel %vm1890_vm7, %v2305_v17, %v1887_v12 }
 0x19d   : > { %v1896_v13 = vsel %vm1893_vm8, %v1895_v41, %v1891_v54  ;;  %v1940_v10 = vor.u32 1.1754944e-38, %v1939_v34  ;;  %vm1938_vm13 = vcmp.eq.f32.partialorder %v1937_v51, 8.507059e+37 }
 0x19e   : > { %v1969_v30 = vmul.f32 %v1896_v13, %v3471_v38 }
 0x1a0   : > { %1986 = vst.msk [vmem:[%s3378_s8 + $0x58] sm:$0xff] %vm1974_vm5, %v1969_v30  ;;  %v2309_v35 = vpop.eup %2308 }
 0x1a1   : > { %v2311_v32 = vpop.eup %2310  ;;  %v1717_v48 = vadd.f32 1.0, %v2309_v35 }
 0x1a2   : > { %v1929_v55 = vmul.f32 %v2311_v32, %v1716_v63  ;;  %vm1934_vm9 = vweird.f32 %v2311_v32 }
 0x1a3   : > { %2312 = vrcp.f32 %v1717_v48  ;;  %vm1935_vm12 = vmor %vm1933_vm10, %vm1934_vm9  ;;  %v1954_v49 = vand.u32 2147483648, %v1717_v48  ;;  %v1952_v29 = vand.u32 2147483647, %v1717_v48  ;;  %vm1948_vm15 = vweird.f32 %v1717_v48 }
 0x1a4   : > { %v1930_v19 = vsub.f32 1.0, %v1929_v55 }
 0x1a5   : > { %v1955_v1 = vor.u32 1.1754944e-38, %v1954_v49  ;;  %vm1953_vm3 = vcmp.eq.f32.partialorder %v1952_v29, 8.507059e+37 }
 0x1a6   : > { %v1931_v62 = vmul.f32 %v2311_v32, %v1930_v19 }
 0x1a8   : > { %v1932_v23 = vadd.f32 %v2311_v32, %v1931_v62 }
 0x1a9   : > { %v2313_v46 = vpop.eup %2312 }
 0x1aa   : > { %v1936_v14 = vsel %vm1935_vm12, %v2311_v32, %v1932_v23  ;;  %v1944_v38 = vmul.f32 %v2313_v46, %v1717_v48  ;;  %vm1949_vm14 = vweird.f32 %v2313_v46 }
 0x1ab   : > { %v1941_v24 = vsel %vm1938_vm13, %v1940_v10, %v1936_v14  ;;  %vm1950_vm0 = vmor %vm1948_vm15, %vm1949_vm14 }
 0x1ac   : > { %v1972_v6 = vmul.f32 %v1941_v24, %v1652_v57  ;;  %v1945_v15 = vsub.f32 1.0, %v1944_v38 }
 0x1ae   : > { %1989 = vst.msk [vmem:[%s3378_s8 + $0x70] sm:$0xff] %vm1974_vm5, %v1972_v6  ;;  %v1946_v11 = vmul.f32 %v2313_v46, %v1945_v15 }
 0x1b0   : > { %v1947_v43 = vadd.f32 %v2313_v46, %v1946_v11 }
 0x1b2   : > { %v1951_v59 = vsel %vm1950_vm0, %v2313_v46, %v1947_v43 }
 0x1b3   : > { %v1956_v3 = vsel %vm1953_vm3, %v1955_v1, %v1951_v59 }
 0x1b4   : > { %v1973_v40 = vmul.f32 %v1956_v3, %v1653_v47 }
 0x1b6   : > { %1990 = vst.msk [vmem:[%s3378_s8 + $0x78] sm:$0xff] %vm1974_vm5, %v1973_v40 }
 0x1b7 PF: > { %s17_s28 = sadd.s32 1, %s2355_s28   ;;  %s3595_s24 = smov %s2347_s26 }
 0x1b8   : > { %p14_p7 = scmp.ge.s32.totalorder %s17_s28, 6   ;;  %s3596_s25 = smov %s2351_s27 }
 0x1b9   : > { %s3597_s26 = smov %s3600_s29  ;;  %s3598_s27 = smov %s3604_s30 }
 0x1ba   :  { %16 = sbr.rel (!%p14_p7) target bundleno = 3 (0x3), region = 79 }

</bundles_post_ra>
